<compile_context>
chip_gen: v7x
topology: tpu7x:2x2x1
jax: 0.10.0
libtpu: 0.0.40
codegen_flags: <defaults>
</compile_context>

<pallas_src>
import functools

import jax
import jax.numpy as jnp
from jax.experimental import pallas as pl
from jax.experimental.pallas import tpu as pltpu

IN_DIM = 32 * 32           # fixed by the module (nn.Linear(32*32, E))
NUM_CLASSES = 10
HEAD_PAD = 128             # classifier head padded to one full lane group
_NEG_BIG = -1e30           # logit filler for padded classes -> softmax prob exactly 0


def _round_up(x, m):
    return ((x + m - 1) // m) * m


def _mlp_softmax_kernel(x_ref, w1_ref, b1_ref, w2_ref, b2_ref,
                        w3_ref, b3_ref, w4_ref, b4_ref, o_ref):
    """Fused: 3x (Linear[+ReLU]) embed -> ReLU -> Linear(E,128pad) -> Softmax."""
    # bf16 MXU inputs, f32 accumulation; elementwise math kept in f32 (v5e-safe).
    h = jnp.dot(x_ref[...], w1_ref[...],
                preferred_element_type=jnp.float32) + b1_ref[...]
    h = jnp.maximum(h, 0.0)
    h = jnp.dot(h.astype(jnp.bfloat16), w2_ref[...],
                preferred_element_type=jnp.float32) + b2_ref[...]
    h = jnp.maximum(h, 0.0)
    h = jnp.dot(h.astype(jnp.bfloat16), w3_ref[...],
                preferred_element_type=jnp.float32) + b3_ref[...]

    # classify: ReLU (+Dropout=id), Linear(E, 128-padded), Softmax(dim=1)
    h = jnp.maximum(h, 0.0)
    logits = jnp.dot(h.astype(jnp.bfloat16), w4_ref[...],
                     preferred_element_type=jnp.float32) + b4_ref[...]

    m = jnp.max(logits, axis=1, keepdims=True)
    e = jnp.exp(logits - m)
    inv = pl.reciprocal(jnp.sum(e, axis=1, keepdims=True), approx=True)
    o_ref[...] = (e * inv).astype(o_ref.dtype)


@functools.partial(jax.jit, static_argnames=("block_b",))
def mnist_classifier_forward(x, params, *, block_b=None):
    """x: (B, 32, 32) float32.  Returns (B, 10) softmax probabilities."""
    B = x.shape[0]
    assert x.shape[1] * x.shape[2] == IN_DIM

    if block_b is None:
        block_b = min(256, _round_up(B, 16))
    block_b = _round_up(block_b, 16)           # bf16 sublane-pack friendly
    B_pad = _round_up(B, block_b)

    # rearrange 'b w h -> b (w h)', cast matmul input to bf16, pad batch to tile
    x_flat = x.reshape(B, IN_DIM).astype(jnp.bfloat16)
    if B_pad != B:
        x_flat = jnp.pad(x_flat, ((0, B_pad - B), (0, 0)))

    w1, b1, w2, b2, w3, b3, w4, b4 = params
    E = w1.shape[1]

    # Pad classifier head to a lane-dense 128-wide slab; padded lanes get a huge
    # negative bias so softmax assigns them exactly 0.
    w4p = jnp.zeros((E, HEAD_PAD), jnp.float32).at[:, :NUM_CLASSES].set(w4)
    b4p = jnp.full((1, HEAD_PAD), _NEG_BIG, jnp.float32).at[:, :NUM_CLASSES].set(b4)

    w1b = w1.astype(jnp.bfloat16)
    w2b = w2.astype(jnp.bfloat16)
    w3b = w3.astype(jnp.bfloat16)
    w4b = w4p.astype(jnp.bfloat16)

    grid = (B_pad // block_b,)

    def row_map(i):
        return (i, 0)

    def rep_map(i):            # weights / biases: same block for every grid step
        return (0, 0)

    flops = 2 * B_pad * (IN_DIM * E + 2 * E * E + E * HEAD_PAD)
    bytes_accessed = (B_pad * IN_DIM * 2                                   # x (bf16)
                      + (IN_DIM * E + 2 * E * E + E * HEAD_PAD) * 2        # weights (bf16)
                      + (3 * E + HEAD_PAD) * 4                             # biases (f32)
                      + B_pad * HEAD_PAD * 4)                              # output (f32)

    out = pl.pallas_call(
        _mlp_softmax_kernel,
        out_shape=jax.ShapeDtypeStruct((B_pad, HEAD_PAD), jnp.float32),
        grid_spec=pltpu.PrefetchScalarGridSpec(
            num_scalar_prefetch=0,
            grid=grid,
            in_specs=[
                pl.BlockSpec((block_b, IN_DIM), row_map),       # x tile (bf16)
                pl.BlockSpec((IN_DIM, E), rep_map),             # W1 (bf16)
                pl.BlockSpec((1, E), rep_map),                  # b1 (f32)
                pl.BlockSpec((E, E), rep_map),                  # W2 (bf16)
                pl.BlockSpec((1, E), rep_map),                  # b2 (f32)
                pl.BlockSpec((E, E), rep_map),                  # W3 (bf16)
                pl.BlockSpec((1, E), rep_map),                  # b3 (f32)
                pl.BlockSpec((E, HEAD_PAD), rep_map),           # W4 padded (bf16)
                pl.BlockSpec((1, HEAD_PAD), rep_map),           # b4 padded (f32)
            ],
            out_specs=pl.BlockSpec((block_b, HEAD_PAD), row_map),
        ),
        compiler_params=pltpu.CompilerParams(
            dimension_semantics=("parallel",),
        ),
        cost_estimate=pl.CostEstimate(
            flops=flops,
            transcendentals=B_pad * HEAD_PAD,
            bytes_accessed=bytes_accessed,
        ),
    )(x_flat, w1b, b1, w2b, b2, w3b, b3, w4b, b4p)

    return out[:B, :NUM_CLASSES]


def init_params(key, embedding_size=128):
    """Deterministic init mimicking nn.Linear's U(-1/sqrt(fan_in), 1/sqrt(fan_in)).
    Weights stored as (in, out)."""
    E = embedding_size
    dims = [(IN_DIM, E), (E, E), (E, E), (E, NUM_CLASSES)]
    params = []
    for (fan_in, fan_out) in dims:
        key, kw, kb = jax.random.split(key, 3)
        bound = 1.0 / (fan_in ** 0.5)
        w = jax.random.uniform(kw, (fan_in, fan_out), jnp.float32, -bound, bound)
        b = jax.random.uniform(kb, (1, fan_out), jnp.float32, -bound, bound)
        params += [w, b]
    return tuple(params)


def reference_forward(x, params):
    """Plain-JAX reference (eval-mode dropout) with matching bf16 matmul inputs."""
    w1, b1, w2, b2, w3, b3, w4, b4 = params

    def mm(a, w):
        return jnp.dot(a.astype(jnp.bfloat16), w.astype(jnp.bfloat16),
                       preferred_element_type=jnp.float32)

    h = x.reshape(x.shape[0], -1)
    h = jax.nn.relu(mm(h, w1) + b1)
    h = jax.nn.relu(mm(h, w2) + b2)
    h = mm(h, w3) + b3
    h = jax.nn.relu(h)
    logits = mm(h, w4) + b4
    return jax.nn.softmax(logits, axis=1)


if __name__ == "__main__":
    key = jax.random.PRNGKey(0)
    k_in, k_param = jax.random.split(key)

    B = 256                    # one full 256-row MXU tile
    EMBED = 128                # small embedding_size (module default is 512)

    x = jax.random.normal(k_in, (B, 32, 32), jnp.float32)
    params = init_params(k_param, embedding_size=EMBED)

    probs = mnist_classifier_forward(x, params)
    probs = jax.block_until_ready(probs)

    ref = reference_forward(x, params)
    assert probs.shape == (B, NUM_CLASSES)
    # tolerances loosened for bf16 matmul inputs + approx reciprocal
    assert jnp.allclose(jnp.sum(probs, axis=1), 1.0, atol=2e-3)
    assert jnp.allclose(probs, ref, atol=2e-3)

    print("KERNEL_OK")
</pallas_src>

<mosaic_0001>
module attributes {stable_mosaic.version = 11 : i64} {
  func.func @_mlp_softmax_kernel(%arg0: i32, %arg1: memref<256x1024xbf16, #tpu.memory_space<vmem>>, %arg2: memref<1024x128xbf16, #tpu.memory_space<vmem>>, %arg3: memref<1x128xf32, #tpu.memory_space<vmem>>, %arg4: memref<128x128xbf16, #tpu.memory_space<vmem>>, %arg5: memref<1x128xf32, #tpu.memory_space<vmem>>, %arg6: memref<128x128xbf16, #tpu.memory_space<vmem>>, %arg7: memref<1x128xf32, #tpu.memory_space<vmem>>, %arg8: memref<128x128xbf16, #tpu.memory_space<vmem>>, %arg9: memref<1x128xf32, #tpu.memory_space<vmem>>, %arg10: memref<256x128xf32, #tpu.memory_space<vmem>>) attributes {dimension_semantics = [#tpu.dimension_semantics<parallel>], iteration_bounds = array<i64: 1>, scalar_prefetch = 0 : i64, scratch_operands = 0 : i64, tpu.core_type = #tpu.core_type<tc>, window_params = [{transform_indices = @transform_0, window_bounds = array<i64: 256, 1024>}, {pipeline_mode = #tpu.pipeline_mode<synchronous>, transform_indices = @transform_1, window_bounds = array<i64: 1024, 128>}, {pipeline_mode = #tpu.pipeline_mode<synchronous>, transform_indices = @transform_2, window_bounds = array<i64: 1, 128>}, {pipeline_mode = #tpu.pipeline_mode<synchronous>, transform_indices = @transform_3, window_bounds = array<i64: 128, 128>}, {pipeline_mode = #tpu.pipeline_mode<synchronous>, transform_indices = @transform_4, window_bounds = array<i64: 1, 128>}, {pipeline_mode = #tpu.pipeline_mode<synchronous>, transform_indices = @transform_5, window_bounds = array<i64: 128, 128>}, {pipeline_mode = #tpu.pipeline_mode<synchronous>, transform_indices = @transform_6, window_bounds = array<i64: 1, 128>}, {pipeline_mode = #tpu.pipeline_mode<synchronous>, transform_indices = @transform_7, window_bounds = array<i64: 128, 128>}, {pipeline_mode = #tpu.pipeline_mode<synchronous>, transform_indices = @transform_8, window_bounds = array<i64: 1, 128>}, {transform_indices = @transform_9, window_bounds = array<i64: 256, 128>}]} {
    %c0 = arith.constant 0 : index
    %c0_0 = arith.constant 0 : index
    %0 = vector.load %arg1[%c0, %c0_0] : memref<256x1024xbf16, #tpu.memory_space<vmem>>, vector<256x1024xbf16>
    %c0_1 = arith.constant 0 : index
    %c0_2 = arith.constant 0 : index
    %1 = vector.load %arg2[%c0_1, %c0_2] : memref<1024x128xbf16, #tpu.memory_space<vmem>>, vector<1024x128xbf16>
    %cst = arith.constant dense<0.000000e+00> : vector<256x128xf32>
    %2 = tpu.matmul %0, %1, %cst {dimension_numbers = #tpu.dot_dimension_numbers<[1], [0], [0], [1], [0, 0, 1, 1], [], []>} : vector<256x1024xbf16>, vector<1024x128xbf16>, vector<256x128xf32> -> vector<256x128xf32>
    %c0_3 = arith.constant 0 : index
    %c0_4 = arith.constant 0 : index
    %3 = vector.load %arg3[%c0_3, %c0_4] : memref<1x128xf32, #tpu.memory_space<vmem>>, vector<1x128xf32>
    %4 = vector.broadcast %3 : vector<1x128xf32> to vector<256x128xf32>
    %5 = arith.addf %2, %4 : vector<256x128xf32>
    %cst_5 = arith.constant 0.000000e+00 : f32
    %6 = vector.broadcast %cst_5 : f32 to vector<256x128xf32>
    %7 = arith.maximumf %5, %6 : vector<256x128xf32>
    %8 = arith.truncf %7 : vector<256x128xf32> to vector<256x128xbf16>
    %c0_6 = arith.constant 0 : index
    %c0_7 = arith.constant 0 : index
    %9 = vector.load %arg4[%c0_6, %c0_7] : memref<128x128xbf16, #tpu.memory_space<vmem>>, vector<128x128xbf16>
    %cst_8 = arith.constant dense<0.000000e+00> : vector<256x128xf32>
    %10 = tpu.matmul %8, %9, %cst_8 {dimension_numbers = #tpu.dot_dimension_numbers<[1], [0], [0], [1], [0, 0, 1, 1], [], []>} : vector<256x128xbf16>, vector<128x128xbf16>, vector<256x128xf32> -> vector<256x128xf32>
    %c0_9 = arith.constant 0 : index
    %c0_10 = arith.constant 0 : index
    %11 = vector.load %arg5[%c0_9, %c0_10] : memref<1x128xf32, #tpu.memory_space<vmem>>, vector<1x128xf32>
    %12 = vector.broadcast %11 : vector<1x128xf32> to vector<256x128xf32>
    %13 = arith.addf %10, %12 : vector<256x128xf32>
    %cst_11 = arith.constant 0.000000e+00 : f32
    %14 = vector.broadcast %cst_11 : f32 to vector<256x128xf32>
    %15 = arith.maximumf %13, %14 : vector<256x128xf32>
    %16 = arith.truncf %15 : vector<256x128xf32> to vector<256x128xbf16>
    %c0_12 = arith.constant 0 : index
    %c0_13 = arith.constant 0 : index
    %17 = vector.load %arg6[%c0_12, %c0_13] : memref<128x128xbf16, #tpu.memory_space<vmem>>, vector<128x128xbf16>
    %cst_14 = arith.constant dense<0.000000e+00> : vector<256x128xf32>
    %18 = tpu.matmul %16, %17, %cst_14 {dimension_numbers = #tpu.dot_dimension_numbers<[1], [0], [0], [1], [0, 0, 1, 1], [], []>} : vector<256x128xbf16>, vector<128x128xbf16>, vector<256x128xf32> -> vector<256x128xf32>
    %c0_15 = arith.constant 0 : index
    %c0_16 = arith.constant 0 : index
    %19 = vector.load %arg7[%c0_15, %c0_16] : memref<1x128xf32, #tpu.memory_space<vmem>>, vector<1x128xf32>
    %20 = vector.broadcast %19 : vector<1x128xf32> to vector<256x128xf32>
    %21 = arith.addf %18, %20 : vector<256x128xf32>
    %cst_17 = arith.constant 0.000000e+00 : f32
    %22 = vector.broadcast %cst_17 : f32 to vector<256x128xf32>
    %23 = arith.maximumf %21, %22 : vector<256x128xf32>
    %24 = arith.truncf %23 : vector<256x128xf32> to vector<256x128xbf16>
    %c0_18 = arith.constant 0 : index
    %c0_19 = arith.constant 0 : index
    %25 = vector.load %arg8[%c0_18, %c0_19] : memref<128x128xbf16, #tpu.memory_space<vmem>>, vector<128x128xbf16>
    %cst_20 = arith.constant dense<0.000000e+00> : vector<256x128xf32>
    %26 = tpu.matmul %24, %25, %cst_20 {dimension_numbers = #tpu.dot_dimension_numbers<[1], [0], [0], [1], [0, 0, 1, 1], [], []>} : vector<256x128xbf16>, vector<128x128xbf16>, vector<256x128xf32> -> vector<256x128xf32>
    %c0_21 = arith.constant 0 : index
    %c0_22 = arith.constant 0 : index
    %27 = vector.load %arg9[%c0_21, %c0_22] : memref<1x128xf32, #tpu.memory_space<vmem>>, vector<1x128xf32>
    %28 = vector.broadcast %27 : vector<1x128xf32> to vector<256x128xf32>
    %29 = arith.addf %26, %28 : vector<256x128xf32>
    %cst_23 = arith.constant dense<0xFF800000> : vector<256xf32>
    %30 = vector.multi_reduction <maximumf>, %29, %cst_23 [1] : vector<256x128xf32> to vector<256xf32>
    %31 = vector.shape_cast %30 : vector<256xf32> to vector<256x1xf32>
    %32 = vector.broadcast %31 : vector<256x1xf32> to vector<256x128xf32>
    %33 = arith.subf %29, %32 : vector<256x128xf32>
    %34 = math.exp %33 : vector<256x128xf32>
    %cst_24 = arith.constant dense<0.000000e+00> : vector<256xf32>
    %35 = vector.multi_reduction <add>, %34, %cst_24 [1] : vector<256x128xf32> to vector<256xf32>
    %36 = vector.shape_cast %35 : vector<256xf32> to vector<256x1xf32>
    %37 = tpu.reciprocal %36 {approx = true} : vector<256x1xf32> -> vector<256x1xf32>
    %38 = vector.broadcast %37 : vector<256x1xf32> to vector<256x128xf32>
    %39 = arith.mulf %34, %38 : vector<256x128xf32>
    %c0_25 = arith.constant 0 : index
    %c0_26 = arith.constant 0 : index
    %40 = vector.load %arg10[%c0_25, %c0_26] : memref<256x128xf32, #tpu.memory_space<vmem>>, vector<256x128xf32>
    tpu.vector_store %arg10[%c0_25, %c0_26], %39 {strides = array<i32>} : memref<256x128xf32, #tpu.memory_space<vmem>>, vector<256x128xf32>,
    return
  }
  func.func @transform_0(%arg0: i32) -> (i32, i32) {
    %c0_i32 = arith.constant 0 : i32
    %c0_i32_0 = arith.constant 0 : i32
    return %arg0, %c0_i32 : i32, i32
  }
  func.func @transform_1(%arg0: i32) -> (i32, i32) {
    %c0_i32 = arith.constant 0 : i32
    %c0_i32_0 = arith.constant 0 : i32
    %c0_i32_1 = arith.constant 0 : i32
    return %c0_i32, %c0_i32_0 : i32, i32
  }
  func.func @transform_2(%arg0: i32) -> (i32, i32) {
    %c0_i32 = arith.constant 0 : i32
    %c0_i32_0 = arith.constant 0 : i32
    %c0_i32_1 = arith.constant 0 : i32
    return %c0_i32, %c0_i32_0 : i32, i32
  }
  func.func @transform_3(%arg0: i32) -> (i32, i32) {
    %c0_i32 = arith.constant 0 : i32
    %c0_i32_0 = arith.constant 0 : i32
    %c0_i32_1 = arith.constant 0 : i32
    return %c0_i32, %c0_i32_0 : i32, i32
  }
  func.func @transform_4(%arg0: i32) -> (i32, i32) {
    %c0_i32 = arith.constant 0 : i32
    %c0_i32_0 = arith.constant 0 : i32
    %c0_i32_1 = arith.constant 0 : i32
    return %c0_i32, %c0_i32_0 : i32, i32
  }
  func.func @transform_5(%arg0: i32) -> (i32, i32) {
    %c0_i32 = arith.constant 0 : i32
    %c0_i32_0 = arith.constant 0 : i32
    %c0_i32_1 = arith.constant 0 : i32
    return %c0_i32, %c0_i32_0 : i32, i32
  }
  func.func @transform_6(%arg0: i32) -> (i32, i32) {
    %c0_i32 = arith.constant 0 : i32
    %c0_i32_0 = arith.constant 0 : i32
    %c0_i32_1 = arith.constant 0 : i32
    return %c0_i32, %c0_i32_0 : i32, i32
  }
  func.func @transform_7(%arg0: i32) -> (i32, i32) {
    %c0_i32 = arith.constant 0 : i32
    %c0_i32_0 = arith.constant 0 : i32
    %c0_i32_1 = arith.constant 0 : i32
    return %c0_i32, %c0_i32_0 : i32, i32
  }
  func.func @transform_8(%arg0: i32) -> (i32, i32) {
    %c0_i32 = arith.constant 0 : i32
    %c0_i32_0 = arith.constant 0 : i32
    %c0_i32_1 = arith.constant 0 : i32
    return %c0_i32, %c0_i32_0 : i32, i32
  }
  func.func @transform_9(%arg0: i32) -> (i32, i32) {
    %c0_i32 = arith.constant 0 : i32
    %c0_i32_0 = arith.constant 0 : i32
    return %arg0, %c0_i32 : i32, i32
  }
}

</mosaic_0001>

<bundles_post_ra>
// kernel: mnist_classifier_forward.1
= control target key start
LH: loop header
LB: loop body
LE: loop exit
PB: predicated region body
PF: predicated region fallthrough
CT: control target
= control target key end

     0   :  { %s5700_s1 = inlined_call_operand.vmem [shape: bf16[1024,128], index: 1, kind: input, shape index: {}]   ;;  %s5701_s0 = inlined_call_operand.vmem [shape: bf16[256,1024], index: 0, kind: input, shape index: {}]   ;;  %s5702_s3 = inlined_call_operand.vmem [shape: bf16[128,128], index: 3, kind: input, shape index: {}]   ;;  %s5703_s2 = inlined_call_operand.vmem [shape: f32[1,128], index: 2, kind: input, shape index: {}]   ;;  %s5704_s5 = inlined_call_operand.vmem [shape: bf16[128,128], index: 5, kind: input, shape index: {}]   ;;  %s5705_s4 = inlined_call_operand.vmem [shape: f32[1,128], index: 4, kind: input, shape index: {}]   ;;  %s5706_s7 = inlined_call_operand.vmem [shape: bf16[128,128], index: 7, kind: input, shape index: {}]   ;;  %s5707_s6 = inlined_call_operand.vmem [shape: f32[1,128], index: 6, kind: input, shape index: {}]   ;;  %s5708_s8 = inlined_call_operand.vmem [shape: f32[1,128], index: 8, kind: input, shape index: {}]   ;;  %s5709_s9 = inlined_call_operand.vmem [shape: f32[256,128], index: 9, kind: output, shape index: {}]  }
   0x1   :  { %v4028_v0 = vld [vmem:[%s5700_s1 + $0x40] sm:$0xff]   ;;  %v4030_v2 = vld [vmem:[%s5700_s1 + $0x48] sm:$0xff]   ;;  %v4032_v4 = vld [vmem:[%s5700_s1 + $0x50] sm:$0xff]  }
   0x2   :  { %v4029_v1 = vld [vmem:[%s5700_s1] sm:$0xff]   ;;  %3348 = vmatprep.subr.bf16.mxu0 %v4028_v0  ;;  %4012 = vmatprep.subr.bf16.mxu1 %v4028_v0  ;;  %v4031_v3 = vld [vmem:[%s5700_s1 + $0x8] sm:$0xff]   ;;  %v4033_v5 = vld [vmem:[%s5700_s1 + $0x10] sm:$0xff]  }
   0x3   :  { %3349 = vmatpush3.bf16.msra.mxu0 %v4029_v1  ;;  %4020 = vmatpush3.bf16.msra.mxu1 %v4029_v1  ;;  %v4034_v6 = vld [vmem:[%s5700_s1 + $0x58] sm:$0xff]   ;;  %v4036_v8 = vld [vmem:[%s5700_s1 + $0x60] sm:$0xff]   ;;  %v4038_v10 = vld [vmem:[%s5700_s1 + $0x68] sm:$0xff]  }
   0x4   :  { %3350 = vmatprep.subr.bf16.mxu0 %v4030_v2  ;;  %4013 = vmatprep.subr.bf16.mxu1 %v4030_v2  ;;  %v4035_v7 = vld [vmem:[%s5700_s1 + $0x18] sm:$0xff]   ;;  %v4037_v9 = vld [vmem:[%s5700_s1 + $0x20] sm:$0xff]   ;;  %v4039_v17 = vld [vmem:[%s5700_s1 + $0x28] sm:$0xff]  }
   0x5   :  { %v33_v11 = vld [vmem:[%s5701_s0] sm:$0xff]  ;;  %v4040_v18 = vld [vmem:[%s5700_s1 + $0x70] sm:$0xff]   ;;  %v4042_v20 = vld [vmem:[%s5700_s1 + $0x78] sm:$0xff]  }
   0x6   :  { %v37_v12 = vld [vmem:[%s5701_s0 + $0x20] sm:$0xff]  ;;  %v4041_v19 = vld [vmem:[%s5700_s1 + $0x30] sm:$0xff]   ;;  %v4043_v21 = vld [vmem:[%s5700_s1 + $0x38] sm:$0xff]  }
   0x7   :  { %3351 = vmatpush3.bf16.msra.mxu0 %v4031_v3  ;;  %4021 = vmatpush3.bf16.msra.mxu1 %v4031_v3  ;;  %v129_v13 = vld [vmem:[%s5701_s0 + $0x300] sm:$0xff]  ;;  %v3130_v14 = vcombine.high %v33_v11, %v37_v12  ;;  %v3129_v27 = vcombine.low %v33_v11, %v37_v12  ;;  %v4046_v31 = vld [vmem:[%s5700_s1 + $0xc8] sm:$0xff]   ;;  %v4048_v34 = vld [vmem:[%s5700_s1 + $0xd0] sm:$0xff]  }
   0x8   :  { %3352 = vmatprep.subr.bf16.mxu0 %v4032_v4  ;;  %4014 = vmatprep.subr.bf16.mxu1 %v4032_v4  ;;  %v133_v15 = vld [vmem:[%s5701_s0 + $0x320] sm:$0xff]  ;;  %v4047_v33 = vld [vmem:[%s5700_s1 + $0x88] sm:$0xff]   ;;  %v4049_v41 = vld [vmem:[%s5700_s1 + $0x90] sm:$0xff]  }
   0x9   :  { %v3226_v16 = vcombine.high %v129_v13, %v133_v15  ;;  %1352 = vmatprep.mubr.bf16.mxu0 %v3130_v14  ;;  %v4044_v22 = vld [vmem:[%s5700_s1 + $0xc0] sm:$0xff]   ;;  %v3225_v28 = vcombine.low %v129_v13, %v133_v15  ;;  %v4050_v43 = vld [vmem:[%s5700_s1 + $0xd8] sm:$0xff]   ;;  %v4054_v56 = vld [vmem:[%s5700_s1 + $0xe8] sm:$0xff]  }
   0xa   :  { %v41_v23 = vld [vmem:[%s5701_s0 + $0x40] sm:$0xff]  ;;  %v4051_v45 = vld [vmem:[%s5700_s1 + $0x98] sm:$0xff]   ;;  %v4055_v58 = vld [vmem:[%s5700_s1 + $0xa8] sm:$0xff]  }
   0xb   :  { %3353 = vmatpush3.bf16.msra.mxu0 %v4033_v5  ;;  %4022 = vmatpush3.bf16.msra.mxu1 %v4033_v5  ;;  %v45_v24 = vld [vmem:[%s5701_s0 + $0x60] sm:$0xff]  ;;  %v4056_v60 = vld [vmem:[%s5700_s1 + $0xf0] sm:$0xff]   ;;  %v34_v63 = vld [vmem:[%s5701_s0 + $0x8] sm:$0xff] }
   0xc   :  { %3354 = vmatprep.subr.bf16.mxu0 %v4034_v6  ;;  %4015 = vmatprep.subr.bf16.mxu1 %v4034_v6  ;;  %v137_v25 = vld [vmem:[%s5701_s0 + $0x340] sm:$0xff]  ;;  %v3138_v30 = vcombine.high %v41_v23, %v45_v24  ;;  %v3137_v39 = vcombine.low %v41_v23, %v45_v24  ;;  %v38_v0 = vld [vmem:[%s5701_s0 + $0x28] sm:$0xff]  ;;  %v4057_v5 = vld [vmem:[%s5700_s1 + $0xb0] sm:$0xff]  }
   0xd   :  { %1448 = vmatprep.mubr.bf16.mxu1 %v3226_v16  ;;  %v141_v26 = vld [vmem:[%s5701_s0 + $0x360] sm:$0xff]  ;;  %v4068_v1 = vld [vmem:[%s5700_s1 + $0x148] sm:$0xff]   ;;  %v4071_v11 = vld [vmem:[%s5700_s1 + $0x110] sm:$0xff]  }
   0xe   :  { %v4045_v29 = vld [vmem:[%s5700_s1 + $0x80] sm:$0xff]   ;;  %v3234_v32 = vcombine.high %v137_v25, %v141_v26  ;;  %v3233_v40 = vcombine.low %v137_v25, %v141_v26  ;;  %v4069_v2 = vld [vmem:[%s5700_s1 + $0x108] sm:$0xff]   ;;  %v4072_v14 = vld [vmem:[%s5700_s1 + $0x158] sm:$0xff]  }
   0xf   :  { %3355 = vmatpush3.bf16.msra.mxu0 %v4035_v7  ;;  %4023 = vmatpush3.bf16.msra.mxu1 %v4035_v7  ;;  %v49_v35 = vld [vmem:[%s5701_s0 + $0x80] sm:$0xff]  ;;  %v4058_v7 = vld [vmem:[%s5700_s1 + $0xf8] sm:$0xff]   ;;  %v42_v16 = vld [vmem:[%s5701_s0 + $0x48] sm:$0xff] }
  0x10   :  { %3356 = vmatprep.subr.bf16.mxu0 %v4036_v8  ;;  %4016 = vmatprep.subr.bf16.mxu1 %v4036_v8  ;;  %v53_v36 = vld [vmem:[%s5701_s0 + $0xa0] sm:$0xff]  ;;  %v3132_v8 = vcombine.high %v34_v63, %v38_v0  ;;  %v4062_v23 = vld [vmem:[%s5700_s1 + $0x1c8] sm:$0xff]   ;;  %v4073_v24 = vld [vmem:[%s5700_s1 + $0x118] sm:$0xff]  }
  0x11   :  { %v145_v37 = vld [vmem:[%s5701_s0 + $0x380] sm:$0xff]  ;;  %v3146_v42 = vcombine.high %v49_v35, %v53_v36  ;;  %v3145_v51 = vcombine.low %v49_v35, %v53_v36 }
  0x12   :  { %v149_v38 = vld [vmem:[%s5701_s0 + $0x3a0] sm:$0xff] }
  0x13   :  { %3357 = vmatpush3.bf16.msra.mxu0 %v4037_v9  ;;  %4024 = vmatpush3.bf16.msra.mxu1 %v4037_v9  ;;  %v3242_v44 = vcombine.high %v145_v37, %v149_v38  ;;  %v4052_v46 = vld [vmem:[%s5700_s1 + $0xe0] sm:$0xff]   ;;  %v3241_v52 = vcombine.low %v145_v37, %v149_v38  ;;  %v4059_v9 = vld [vmem:[%s5700_s1 + $0xb8] sm:$0xff]   ;;  %v4067_v37 = vld [vmem:[%s5700_s1 + $0x190] sm:$0xff]  }
  0x14   :  { %3358 = vmatprep.subr.bf16.mxu0 %v4038_v10  ;;  %4017 = vmatprep.subr.bf16.mxu1 %v4038_v10  ;;  %v57_v47 = vld [vmem:[%s5701_s0 + $0xc0] sm:$0xff]  ;;  %v4070_v10 = vld [vmem:[%s5700_s1 + $0x150] sm:$0xff]   ;;  %v4075_v38 = vld [vmem:[%s5700_s1 + $0x1d8] sm:$0xff]  }
  0x15   :  { %v61_v48 = vld [vmem:[%s5701_s0 + $0xe0] sm:$0xff] }
  0x16   :  { %v153_v49 = vld [vmem:[%s5701_s0 + $0x3c0] sm:$0xff]  ;;  %v3154_v54 = vcombine.high %v57_v47, %v61_v48  ;;  %v3153_v3 = vcombine.low %v57_v47, %v61_v48  ;;  %v4081_v47 = vld [vmem:[%s5700_s1 + $0x130] sm:$0xff]  }
  0x17   :  { %3359 = vmatpush3.bf16.msra.mxu0 %v4039_v17  ;;  %4025 = vmatpush3.bf16.msra.mxu1 %v4039_v17  ;;  %v157_v50 = vld [vmem:[%s5701_s0 + $0x3e0] sm:$0xff]  ;;  %v46_v17 = vld [vmem:[%s5701_s0 + $0x68] sm:$0xff] }
  0x18   :  { %3360 = vmatprep.subr.bf16.mxu0 %v4040_v18  ;;  %4018 = vmatprep.subr.bf16.mxu1 %v4040_v18  ;;  %v4053_v53 = vld [vmem:[%s5700_s1 + $0xa0] sm:$0xff]   ;;  %v3250_v57 = vcombine.high %v153_v49, %v157_v50  ;;  %v3249_v4 = vcombine.low %v153_v49, %v157_v50  ;;  %v3131_v18 = vcombine.low %v34_v63, %v38_v0 }
  0x19   :  { %v4064_v55 = vld [vmem:[%s5700_s1 + $0x140] sm:$0xff]  }
  0x1a   :  { %v4065_v59 = vld [vmem:[%s5700_s1 + $0x100] sm:$0xff]  }
  0x1b   :  { %3361 = vmatpush3.bf16.msra.mxu0 %v4041_v19  ;;  %4026 = vmatpush3.bf16.msra.mxu1 %v4041_v19  ;;  %v65_v61 = vld [vmem:[%s5701_s0 + $0x100] sm:$0xff] }
  0x1c   :  { %3362 = vmatprep.subr.bf16.mxu0 %v4042_v20  ;;  %4019 = vmatprep.subr.bf16.mxu1 %v4042_v20  ;;  %v69_v62 = vld [vmem:[%s5701_s0 + $0x120] sm:$0xff] }
  0x1d   :  { %v3162_v6 = vcombine.high %v65_v61, %v69_v62  ;;  %v4060_v12 = vld [vmem:[%s5700_s1 + $0x1c0] sm:$0xff]   ;;  %v3161_v19 = vcombine.low %v65_v61, %v69_v62  ;;  %v4087_v61 = vld [vmem:[%s5700_s1 + $0x1a8] sm:$0xff]   ;;  %v4088_v62 = vld [vmem:[%s5700_s1 + $0x1f0] sm:$0xff]  }
  0x1e   :  { %v73_v13 = vld [vmem:[%s5701_s0 + $0x140] sm:$0xff] }
  0x1f   :  { %3363 = vmatpush3.bf16.msra.mxu0 %v4043_v21  ;;  %4027 = vmatpush3.bf16.msra.mxu1 %v4043_v21  ;;  %v77_v15 = vld [vmem:[%s5701_s0 + $0x160] sm:$0xff] }
  0x20   :  { %3460 = vmatprep.subr.bf16.mxu1 %v4044_v22  ;;  %3572 = vmatprep.subr.bf16.mxu0 %v4064_v55  ;;  %v4061_v20 = vld [vmem:[%s5700_s1 + $0x180] sm:$0xff]   ;;  %v3170_v21 = vcombine.high %v73_v13, %v77_v15  ;;  %v3140_v22 = vcombine.high %v42_v16, %v46_v17  ;;  %v4083_v55 = vld [vmem:[%s5700_s1 + $0x138] sm:$0xff]  }
  0x21   :  { %v81_v25 = vld [vmem:[%s5701_s0 + $0x180] sm:$0xff] }
  0x22   :  { %1353 = vmatmul.mubr.bf16.vlgmr.msra.gmra.mrb[0].mxu0 %v3129_v27  ;;  %1449 = vmatmul.mubr.bf16.vlgmr.msra.gmra.mrb[0].mxu1 %v3225_v28  ;;  %v85_v26 = vld [vmem:[%s5701_s0 + $0x1a0] sm:$0xff]  ;;  %v50_v28 = vld [vmem:[%s5701_s0 + $0x88] sm:$0xff] }
  0x23   :  { %3461 = vmatpush3.bf16.msra.mxu1 %v4045_v29  ;;  %1360 = vmatprep.mubr.bf16.mxu0 %v3138_v30  ;;  %v4074_v27 = vld [vmem:[%s5700_s1 + $0x160] sm:$0xff]   ;;  %v54_v29 = vld [vmem:[%s5701_s0 + $0xa8] sm:$0xff]  ;;  %v3178_v35 = vcombine.high %v81_v25, %v85_v26  ;;  %v3177_v49 = vcombine.low %v81_v25, %v85_v26 }
  0x24   :  { %3462 = vmatprep.subr.bf16.mxu1 %v4046_v31  ;;  %1456 = vmatprep.mubr.bf16.mxu1 %v3234_v32  ;;  %v4063_v30 = vld [vmem:[%s5700_s1 + $0x188] sm:$0xff]   ;;  %v4066_v31 = vld [vmem:[%s5700_s1 + $0x1d0] sm:$0xff]   ;;  %v4076_v32 = vld [vmem:[%s5700_s1 + $0x120] sm:$0xff]   ;;  %v3148_v36 = vcombine.high %v50_v28, %v54_v29  ;;  %v3147_v50 = vcombine.low %v50_v28, %v54_v29 }
  0x25   :  { %3573 = vmatpush3.bf16.msra.mxu0 %v4065_v59  ;;  %v4084_v48 = vld [vmem:[%s5700_s1 + $0x1e0] sm:$0xff]   ;;  %v66_v59 = vld [vmem:[%s5701_s0 + $0x108] sm:$0xff] }
  0x26   :  { %3574 = vmatprep.subr.bf16.mxu0 %v4068_v1  ;;  %v94_v25 = vld [vmem:[%s5701_s0 + $0x1e8] sm:$0xff] }
  0x27   :  { %3463 = vmatpush3.bf16.msra.mxu1 %v4047_v33  ;;  %v3169_v33 = vcombine.low %v73_v13, %v77_v15  ;;  %v117_v15 = vld [vmem:[%s5701_s0 + $0x2a0] sm:$0xff] }
  0x28   :  { %3464 = vmatprep.subr.bf16.mxu1 %v4048_v34  ;;  %v3139_v34 = vcombine.low %v42_v16, %v46_v17  ;;  %v82_v16 = vld [vmem:[%s5701_s0 + $0x188] sm:$0xff] }
  0x29   :  { %3575 = vmatpush3.bf16.msra.mxu0 %v4069_v2  ;;  %v86_v17 = vld [vmem:[%s5701_s0 + $0x1a8] sm:$0xff] }
  0x2a   :  { %1361 = vmatmul.mubr.bf16.gmra.mrb[4].mxu0 %v3137_v39  ;;  %1457 = vmatmul.mubr.bf16.gmra.mrb[4].mxu1 %v3233_v40  ;;  %v4078_v39 = vld [vmem:[%s5700_s1 + $0x168] sm:$0xff]  }
  0x2b   :  { %3465 = vmatpush3.bf16.msra.mxu1 %v4049_v41  ;;  %1368 = vmatprep.mubr.bf16.mxu0 %v3146_v42  ;;  %v4079_v40 = vld [vmem:[%s5700_s1 + $0x128] sm:$0xff]   ;;  %v4080_v41 = vld [vmem:[%s5700_s1 + $0x170] sm:$0xff]   ;;  %v89_v42 = vld [vmem:[%s5701_s0 + $0x1c0] sm:$0xff] }
  0x2c   :  { %3466 = vmatprep.subr.bf16.mxu1 %v4050_v43  ;;  %1464 = vmatprep.mubr.bf16.mxu1 %v3242_v44  ;;  %v93_v43 = vld [vmem:[%s5701_s0 + $0x1e0] sm:$0xff]  ;;  %v58_v44 = vld [vmem:[%s5701_s0 + $0xc8] sm:$0xff] }
  0x2d   :  { %3576 = vmatprep.subr.bf16.mxu0 %v4070_v10  ;;  %v3185_v63 = vcombine.low %v89_v42, %v93_v43 }
  0x2e   :  { %3577 = vmatpush3.bf16.msra.mxu0 %v4071_v11 }
  0x2f   :  { %3467 = vmatpush3.bf16.msra.mxu1 %v4051_v45  ;;  %3578 = vmatprep.subr.bf16.mxu0 %v4072_v14  ;;  %v62_v45 = vld [vmem:[%s5701_s0 + $0xe8] sm:$0xff]  ;;  %v113_v14 = vld [vmem:[%s5701_s0 + $0x280] sm:$0xff] }
  0x30   :  { %3468 = vmatprep.subr.bf16.mxu1 %v4052_v46  ;;  %v4077_v46 = vld [vmem:[%s5700_s1 + $0x198] sm:$0xff]   ;;  %v3155_v0 = vcombine.low %v58_v44, %v62_v45  ;;  %v3209_v26 = vcombine.low %v113_v14, %v117_v15 }
  0x32   :  { %1369 = vmatmul.mubr.bf16.gmra.mrb[8].mxu0 %v3145_v51  ;;  %1465 = vmatmul.mubr.bf16.gmra.mrb[8].mxu1 %v3241_v52  ;;  %v3186_v51 = vcombine.high %v89_v42, %v93_v43  ;;  %v3156_v52 = vcombine.high %v58_v44, %v62_v45 }
  0x33   :  { %3469 = vmatpush3.bf16.msra.mxu1 %v4053_v53  ;;  %1376 = vmatprep.mubr.bf16.mxu0 %v3154_v54  ;;  %v4082_v53 = vld [vmem:[%s5700_s1 + $0x178] sm:$0xff]   ;;  %v4085_v54 = vld [vmem:[%s5700_s1 + $0x1a0] sm:$0xff]  }
  0x34   :  { %3470 = vmatprep.subr.bf16.mxu1 %v4054_v56  ;;  %1472 = vmatprep.mubr.bf16.mxu1 %v3250_v57  ;;  %v4086_v56 = vld [vmem:[%s5700_s1 + $0x1e8] sm:$0xff]   ;;  %v97_v57 = vld [vmem:[%s5701_s0 + $0x200] sm:$0xff] }
  0x35   :  { %3579 = vmatpush3.bf16.msra.mxu0 %v4073_v24  ;;  %v90_v24 = vld [vmem:[%s5701_s0 + $0x1c8] sm:$0xff] }
  0x36   :  { %3580 = vmatprep.subr.bf16.mxu0 %v4074_v27  ;;  %v3179_v27 = vcombine.low %v82_v16, %v86_v17  ;;  %v3188_v29 = vcombine.high %v90_v24, %v94_v25 }
  0x37   :  { %3471 = vmatpush3.bf16.msra.mxu1 %v4055_v58  ;;  %v101_v58 = vld [vmem:[%s5701_s0 + $0x220] sm:$0xff] }
  0x38   :  { %3472 = vmatprep.subr.bf16.mxu1 %v4056_v60  ;;  %v70_v60 = vld [vmem:[%s5701_s0 + $0x128] sm:$0xff]  ;;  %v3194_v1 = vcombine.high %v97_v57, %v101_v58  ;;  %v3193_v10 = vcombine.low %v97_v57, %v101_v58  ;;  %v63_v57 = vld [vmem:[%s5701_s0 + $0xf0] sm:$0xff] }
  0x39   :  { %3581 = vmatpush3.bf16.msra.mxu0 %v4076_v32  ;;  %v3164_v2 = vcombine.high %v66_v59, %v70_v60  ;;  %v3163_v11 = vcombine.low %v66_v59, %v70_v60  ;;  %v35_v32 = vld [vmem:[%s5701_s0 + $0x10] sm:$0xff] }
  0x3a   :  { %1377 = vmatmul.mubr.bf16.gmra.mrb[12].mxu0 %v3153_v3  ;;  %1473 = vmatmul.mubr.bf16.gmra.mrb[12].mxu1 %v3249_v4  ;;  %v4089_v3 = vld [vmem:[%s5700_s1 + $0x1b0] sm:$0xff]   ;;  %v4090_v4 = vld [vmem:[%s5700_s1 + $0x1f8] sm:$0xff]  }
  0x3b   :  { %3473 = vmatpush3.bf16.msra.mxu1 %v4057_v5  ;;  %1384 = vmatprep.mubr.bf16.mxu0 %v3162_v6  ;;  %v105_v5 = vld [vmem:[%s5701_s0 + $0x240] sm:$0xff] }
  0x3c   :  { %3474 = vmatprep.subr.bf16.mxu1 %v4058_v7  ;;  %1513 = vmatprep.mubr.bf16.mxu1 %v3132_v8  ;;  %v109_v6 = vld [vmem:[%s5701_s0 + $0x260] sm:$0xff]  ;;  %v74_v7 = vld [vmem:[%s5701_s0 + $0x148] sm:$0xff] }
  0x3d   :  { %3582 = vmatprep.subr.bf16.mxu0 %v4078_v39  ;;  %v78_v8 = vld [vmem:[%s5701_s0 + $0x168] sm:$0xff] }
  0x3e   :  { %3583 = vmatpush3.bf16.msra.mxu0 %v4079_v40  ;;  %v3172_v13 = vcombine.high %v74_v7, %v78_v8  ;;  %v110_v39 = vld [vmem:[%s5701_s0 + $0x268] sm:$0xff]  ;;  %v43_v40 = vld [vmem:[%s5701_s0 + $0x50] sm:$0xff] }
  0x3f   :  { %3475 = vmatpush3.bf16.msra.mxu1 %v4059_v9  ;;  %3584 = vmatprep.subr.bf16.mxu0 %v4080_v41  ;;  %v4091_v9 = vld [vmem:[%s5700_s1 + $0x1b8] sm:$0xff]   ;;  %v47_v41 = vld [vmem:[%s5701_s0 + $0x70] sm:$0xff] }
  0x40   :  { %3684 = vmatprep.subr.bf16.mxu1 %v4060_v12  ;;  %v3202_v12 = vcombine.high %v105_v5, %v109_v6  ;;  %v3142_v45 = vcombine.high %v43_v40, %v47_v41 }
  0x42   :  { %1385 = vmatmul.mubr.bf16.gmra.mrb[16].mxu0 %v3161_v19  ;;  %1514 = vmatmul.mubr.bf16.vlgmr.msra.gmra.mrb[16].mxu1 %v3131_v18  ;;  %v3201_v18 = vcombine.low %v105_v5, %v109_v6  ;;  %v3171_v19 = vcombine.low %v74_v7, %v78_v8  ;;  %v138_v6 = vld [vmem:[%s5701_s0 + $0x348] sm:$0xff]  ;;  %v75_v8 = vld [vmem:[%s5701_s0 + $0x150] sm:$0xff] }
  0x43   :  { %3685 = vmatpush3.bf16.msra.mxu1 %v4061_v20  ;;  %1392 = vmatprep.mubr.bf16.mxu0 %v3170_v21  ;;  %v3210_v20 = vcombine.high %v113_v14, %v117_v15  ;;  %v3180_v21 = vcombine.high %v82_v16, %v86_v17  ;;  %v142_v7 = vld [vmem:[%s5701_s0 + $0x368] sm:$0xff]  ;;  %v83_v16 = vld [vmem:[%s5701_s0 + $0x190] sm:$0xff] }
  0x44   :  { %1521 = vmatprep.mubr.bf16.mxu1 %v3140_v22  ;;  %3686 = vmatprep.subr.bf16.mxu1 %v4062_v23  ;;  %v121_v22 = vld [vmem:[%s5701_s0 + $0x2c0] sm:$0xff]  ;;  %v146_v14 = vld [vmem:[%s5701_s0 + $0x388] sm:$0xff]  ;;  %v87_v17 = vld [vmem:[%s5701_s0 + $0x1b0] sm:$0xff] }
  0x45   :  { %3585 = vmatpush3.bf16.msra.mxu0 %v4081_v47  ;;  %v125_v23 = vld [vmem:[%s5701_s0 + $0x2e0] sm:$0xff]  ;;  %v118_v47 = vld [vmem:[%s5701_s0 + $0x2a8] sm:$0xff] }
  0x46   :  { %3586 = vmatprep.subr.bf16.mxu0 %v4082_v53  ;;  %v3218_v28 = vcombine.high %v121_v22, %v125_v23  ;;  %v150_v15 = vld [vmem:[%s5701_s0 + $0x3a8] sm:$0xff] }
  0x47   :  { %3687 = vmatpush3.bf16.msra.mxu1 %v4063_v30  ;;  %v98_v30 = vld [vmem:[%s5701_s0 + $0x208] sm:$0xff] }
  0x48   :  { %3688 = vmatprep.subr.bf16.mxu1 %v4066_v31  ;;  %v102_v31 = vld [vmem:[%s5701_s0 + $0x228] sm:$0xff] }
  0x49   :  { %3587 = vmatpush3.bf16.msra.mxu0 %v4083_v55  ;;  %v3195_v43 = vcombine.low %v98_v30, %v102_v31  ;;  %v126_v55 = vld [vmem:[%s5701_s0 + $0x2e8] sm:$0xff] }
  0x4a   :  { %1393 = vmatmul.mubr.bf16.gmra.mrb[20].mxu0 %v3169_v33  ;;  %1522 = vmatmul.mubr.bf16.gmra.mrb[20].mxu1 %v3139_v34  ;;  %v39_v33 = vld [vmem:[%s5701_s0 + $0x30] sm:$0xff]  ;;  %v3217_v34 = vcombine.low %v121_v22, %v125_v23  ;;  %v154_v22 = vld [vmem:[%s5701_s0 + $0x3c8] sm:$0xff] }
  0x4b   :  { %1400 = vmatprep.mubr.bf16.mxu0 %v3178_v35  ;;  %1529 = vmatprep.mubr.bf16.mxu1 %v3148_v36  ;;  %v3187_v35 = vcombine.low %v90_v24, %v94_v25  ;;  %v3196_v36 = vcombine.high %v98_v30, %v102_v31  ;;  %v3133_v42 = vcombine.low %v35_v32, %v39_v33  ;;  %v158_v23 = vld [vmem:[%s5701_s0 + $0x3e8] sm:$0xff]  ;;  %v91_v24 = vld [vmem:[%s5701_s0 + $0x1d0] sm:$0xff] }
  0x4c   :  { %3689 = vmatpush3.bf16.msra.mxu1 %v4067_v37  ;;  %v3134_v37 = vcombine.high %v35_v32, %v39_v33  ;;  %v95_v25 = vld [vmem:[%s5701_s0 + $0x1f0] sm:$0xff]  ;;  %v36_v32 = vld [vmem:[%s5701_s0 + $0x18] sm:$0xff] }
  0x4d   :  { %3690 = vmatprep.subr.bf16.mxu1 %v4075_v38  ;;  %v106_v38 = vld [vmem:[%s5701_s0 + $0x248] sm:$0xff]  ;;  %v99_v30 = vld [vmem:[%s5701_s0 + $0x210] sm:$0xff]  ;;  %v40_v33 = vld [vmem:[%s5701_s0 + $0x38] sm:$0xff] }
  0x4e   :  { %v3204_v44 = vcombine.high %v106_v38, %v110_v39  ;;  %v103_v31 = vld [vmem:[%s5701_s0 + $0x230] sm:$0xff] }
  0x50   :  { %3691 = vmatpush3.bf16.msra.mxu1 %v4077_v46  ;;  %v114_v46 = vld [vmem:[%s5701_s0 + $0x288] sm:$0xff] }
  0x51   :  { %3692 = vmatprep.subr.bf16.mxu1 %v4084_v48  ;;  %v51_v48 = vld [vmem:[%s5701_s0 + $0x90] sm:$0xff]  ;;  %v3211_v58 = vcombine.low %v114_v46, %v118_v47 }
  0x52   :  { %1401 = vmatmul.mubr.bf16.gmra.mrb[24].mxu0 %v3177_v49  ;;  %1530 = vmatmul.mubr.bf16.gmra.mrb[24].mxu1 %v3147_v50  ;;  %v55_v49 = vld [vmem:[%s5701_s0 + $0xb0] sm:$0xff]  ;;  %v3203_v50 = vcombine.low %v106_v38, %v110_v39 }
  0x53   :  { %1408 = vmatprep.mubr.bf16.mxu0 %v3186_v51  ;;  %1537 = vmatprep.mubr.bf16.mxu1 %v3156_v52  ;;  %v3141_v51 = vcombine.low %v43_v40, %v47_v41  ;;  %v3212_v52 = vcombine.high %v114_v46, %v118_v47  ;;  %v3150_v53 = vcombine.high %v51_v48, %v55_v49  ;;  %v107_v38 = vld [vmem:[%s5701_s0 + $0x250] sm:$0xff]  ;;  %v44_v40 = vld [vmem:[%s5701_s0 + $0x58] sm:$0xff] }
  0x54   :  { %3693 = vmatpush3.bf16.msra.mxu1 %v4085_v54  ;;  %v122_v54 = vld [vmem:[%s5701_s0 + $0x2c8] sm:$0xff]  ;;  %v3149_v59 = vcombine.low %v51_v48, %v55_v49  ;;  %v111_v39 = vld [vmem:[%s5701_s0 + $0x270] sm:$0xff]  ;;  %v48_v41 = vld [vmem:[%s5701_s0 + $0x78] sm:$0xff] }
  0x55   :  { %3694 = vmatprep.subr.bf16.mxu1 %v4086_v56  ;;  %v59_v56 = vld [vmem:[%s5701_s0 + $0xd0] sm:$0xff]  ;;  %v3220_v60 = vcombine.high %v122_v54, %v126_v55  ;;  %v52_v48 = vld [vmem:[%s5701_s0 + $0x98] sm:$0xff] }
  0x56   :  { %v115_v46 = vld [vmem:[%s5701_s0 + $0x290] sm:$0xff]  ;;  %v56_v49 = vld [vmem:[%s5701_s0 + $0xb8] sm:$0xff] }
  0x57   :  { %v119_v47 = vld [vmem:[%s5701_s0 + $0x2b0] sm:$0xff] }
  0x58   :  { %3695 = vmatpush3.bf16.msra.mxu1 %v4087_v61  ;;  %v3158_v61 = vcombine.high %v59_v56, %v63_v57 }
  0x59   :  { %3696 = vmatprep.subr.bf16.mxu1 %v4088_v62  ;;  %v130_v62 = vld [vmem:[%s5701_s0 + $0x308] sm:$0xff] }
  0x5a   :  { %1409 = vmatmul.mubr.bf16.gmra.mrb[28].mxu0 %v3185_v63  ;;  %1538 = vmatmul.mubr.bf16.gmra.mrb[28].mxu1 %v3155_v0  ;;  %v134_v63 = vld [vmem:[%s5701_s0 + $0x328] sm:$0xff]  ;;  %v67_v0 = vld [vmem:[%s5701_s0 + $0x110] sm:$0xff] }
  0x5b   :  { %1416 = vmatprep.mubr.bf16.mxu0 %v3194_v1  ;;  %1545 = vmatprep.mubr.bf16.mxu1 %v3164_v2  ;;  %v71_v1 = vld [vmem:[%s5701_s0 + $0x130] sm:$0xff]  ;;  %v3219_v2 = vcombine.low %v122_v54, %v126_v55 }
  0x5c   :  { %3697 = vmatpush3.bf16.msra.mxu1 %v4089_v3  ;;  %v3157_v3 = vcombine.low %v59_v56, %v63_v57  ;;  %v3166_v5 = vcombine.high %v67_v0, %v71_v1  ;;  %v123_v54 = vld [vmem:[%s5701_s0 + $0x2d0] sm:$0xff]  ;;  %v60_v56 = vld [vmem:[%s5701_s0 + $0xd8] sm:$0xff] }
  0x5d   :  { %3698 = vmatprep.subr.bf16.mxu1 %v4090_v4  ;;  %v3228_v4 = vcombine.high %v130_v62, %v134_v63  ;;  %v127_v55 = vld [vmem:[%s5701_s0 + $0x2f0] sm:$0xff]  ;;  %v64_v57 = vld [vmem:[%s5701_s0 + $0xf8] sm:$0xff] }
  0x60   :  { %3699 = vmatpush3.bf16.msra.mxu1 %v4091_v9  ;;  %v79_v9 = vld [vmem:[%s5701_s0 + $0x170] sm:$0xff] }
  0x62   :  { %1417 = vmatmul.mubr.bf16.gmra.mrb[32].mxu0 %v3193_v10  ;;  %1546 = vmatmul.mubr.bf16.gmra.mrb[32].mxu1 %v3163_v11  ;;  %v3227_v10 = vcombine.low %v130_v62, %v134_v63  ;;  %v3165_v11 = vcombine.low %v67_v0, %v71_v1  ;;  %v131_v62 = vld [vmem:[%s5701_s0 + $0x310] sm:$0xff]  ;;  %v68_v0 = vld [vmem:[%s5701_s0 + $0x118] sm:$0xff] }
  0x63   :  { %1424 = vmatprep.mubr.bf16.mxu0 %v3202_v12  ;;  %1553 = vmatprep.mubr.bf16.mxu1 %v3172_v13  ;;  %v3236_v12 = vcombine.high %v138_v6, %v142_v7  ;;  %v3174_v13 = vcombine.high %v75_v8, %v79_v9  ;;  %v135_v63 = vld [vmem:[%s5701_s0 + $0x330] sm:$0xff]  ;;  %v72_v1 = vld [vmem:[%s5701_s0 + $0x138] sm:$0xff] }
  0x6a   :  { %1425 = vmatmul.mubr.bf16.gmra.mrb[36].mxu0 %v3201_v18  ;;  %1554 = vmatmul.mubr.bf16.gmra.mrb[36].mxu1 %v3171_v19  ;;  %v3235_v18 = vcombine.low %v138_v6, %v142_v7  ;;  %v3173_v19 = vcombine.low %v75_v8, %v79_v9  ;;  %v139_v6 = vld [vmem:[%s5701_s0 + $0x350] sm:$0xff]  ;;  %v76_v8 = vld [vmem:[%s5701_s0 + $0x158] sm:$0xff] }
  0x6b   :  { %1432 = vmatprep.mubr.bf16.mxu0 %v3210_v20  ;;  %1561 = vmatprep.mubr.bf16.mxu1 %v3180_v21  ;;  %v3244_v20 = vcombine.high %v146_v14, %v150_v15  ;;  %v3182_v21 = vcombine.high %v83_v16, %v87_v17  ;;  %v143_v7 = vld [vmem:[%s5701_s0 + $0x370] sm:$0xff]  ;;  %v80_v9 = vld [vmem:[%s5701_s0 + $0x178] sm:$0xff] }
  0x72   :  { %1433 = vmatmul.mubr.bf16.gmra.mrb[40].mxu0 %v3209_v26  ;;  %1562 = vmatmul.mubr.bf16.gmra.mrb[40].mxu1 %v3179_v27  ;;  %v3243_v26 = vcombine.low %v146_v14, %v150_v15  ;;  %v3181_v27 = vcombine.low %v83_v16, %v87_v17  ;;  %v147_v14 = vld [vmem:[%s5701_s0 + $0x390] sm:$0xff]  ;;  %v84_v16 = vld [vmem:[%s5701_s0 + $0x198] sm:$0xff] }
  0x73   :  { %1440 = vmatprep.mubr.bf16.mxu0 %v3218_v28  ;;  %1569 = vmatprep.mubr.bf16.mxu1 %v3188_v29  ;;  %v3252_v28 = vcombine.high %v154_v22, %v158_v23  ;;  %v3190_v29 = vcombine.high %v91_v24, %v95_v25  ;;  %v151_v15 = vld [vmem:[%s5701_s0 + $0x3b0] sm:$0xff]  ;;  %v88_v17 = vld [vmem:[%s5701_s0 + $0x1b8] sm:$0xff] }
  0x7a   :  { %1441 = vmatmul.mubr.bf16.gmra.mrb[44].mxu0 %v3217_v34  ;;  %1570 = vmatmul.mubr.bf16.gmra.mrb[44].mxu1 %v3187_v35  ;;  %v3251_v34 = vcombine.low %v154_v22, %v158_v23  ;;  %v3189_v35 = vcombine.low %v91_v24, %v95_v25  ;;  %v3184_v22 = vcombine.high %v84_v16, %v88_v17  ;;  %v155_v23 = vld [vmem:[%s5701_s0 + $0x3d0] sm:$0xff]  ;;  %v92_v25 = vld [vmem:[%s5701_s0 + $0x1d8] sm:$0xff] }
  0x7b   :  { %1577 = vmatprep.mubr.bf16.mxu1 %v3196_v36  ;;  %1674 = vmatprep.mubr.bf16.mxu0 %v3134_v37  ;;  %v3198_v36 = vcombine.high %v99_v30, %v103_v31  ;;  %v3136_v37 = vcombine.high %v36_v32, %v40_v33  ;;  %v159_v24 = vld [vmem:[%s5701_s0 + $0x3f0] sm:$0xff] }
  0x82   :  { %1578 = vmatmul.mubr.bf16.gmra.mrb[48].mxu1 %v3195_v43  ;;  %1675 = vmatmul.mubr.bf16.vlgmr.msra.gmra.mrb[48].mxu0 %v3133_v42  ;;  %v3135_v42 = vcombine.low %v36_v32, %v40_v33  ;;  %v3197_v43 = vcombine.low %v99_v30, %v103_v31  ;;  %v4093_v31 = vld [vmem:[%s5702_s3 + $0x8] sm:$0xff]   ;;  %v100_v32 = vld [vmem:[%s5701_s0 + $0x218] sm:$0xff] }
  0x83   :  { %1585 = vmatprep.mubr.bf16.mxu1 %v3204_v44  ;;  %1682 = vmatprep.mubr.bf16.mxu0 %v3142_v45  ;;  %v3206_v44 = vcombine.high %v107_v38, %v111_v39  ;;  %v3144_v45 = vcombine.high %v44_v40, %v48_v41  ;;  %v104_v33 = vld [vmem:[%s5701_s0 + $0x238] sm:$0xff] }
  0x8a   :  { %1586 = vmatmul.mubr.bf16.gmra.mrb[52].mxu1 %v3203_v50  ;;  %1683 = vmatmul.mubr.bf16.gmra.mrb[52].mxu0 %v3141_v51  ;;  %v3205_v50 = vcombine.low %v107_v38, %v111_v39  ;;  %v3143_v51 = vcombine.low %v44_v40, %v48_v41 }
  0x8b   :  { %1593 = vmatprep.mubr.bf16.mxu1 %v3212_v52  ;;  %1690 = vmatprep.mubr.bf16.mxu0 %v3150_v53  ;;  %v3214_v52 = vcombine.high %v115_v46, %v119_v47  ;;  %v3152_v53 = vcombine.high %v52_v48, %v56_v49 }
  0x92   :  { %1594 = vmatmul.mubr.bf16.gmra.mrb[56].mxu1 %v3211_v58  ;;  %1691 = vmatmul.mubr.bf16.gmra.mrb[56].mxu0 %v3149_v59  ;;  %v3213_v58 = vcombine.low %v115_v46, %v119_v47  ;;  %v3151_v59 = vcombine.low %v52_v48, %v56_v49  ;;  %v108_v49 = vld [vmem:[%s5701_s0 + $0x258] sm:$0xff] }
  0x93   :  { %1601 = vmatprep.mubr.bf16.mxu1 %v3220_v60  ;;  %1698 = vmatprep.mubr.bf16.mxu0 %v3158_v61  ;;  %v3222_v60 = vcombine.high %v123_v54, %v127_v55  ;;  %v3160_v61 = vcombine.high %v60_v56, %v64_v57 }
  0x9a   :  { %1602 = vmatmul.mubr.bf16.gmra.mrb[60].mxu1 %v3219_v2  ;;  %1699 = vmatmul.mubr.bf16.gmra.mrb[60].mxu0 %v3157_v3  ;;  %v3221_v2 = vcombine.low %v123_v54, %v127_v55  ;;  %v3159_v3 = vcombine.low %v60_v56, %v64_v57  ;;  %v3199_v54 = vcombine.low %v100_v32, %v104_v33 }
  0x9b   :  { %1609 = vmatprep.mubr.bf16.mxu1 %v3228_v4  ;;  %1706 = vmatprep.mubr.bf16.mxu0 %v3166_v5  ;;  %v3230_v4 = vcombine.high %v131_v62, %v135_v63  ;;  %v3168_v5 = vcombine.high %v68_v0, %v72_v1 }
  0xa2   :  { %1610 = vmatmul.mubr.bf16.gmra.mrb[64].mxu1 %v3227_v10  ;;  %1707 = vmatmul.mubr.bf16.gmra.mrb[64].mxu0 %v3165_v11  ;;  %v3229_v10 = vcombine.low %v131_v62, %v135_v63  ;;  %v3167_v11 = vcombine.low %v68_v0, %v72_v1  ;;  %v4094_v1 = vld [vmem:[%s5702_s3 + $0x10] sm:$0xff]  }
  0xa3   :  { %1617 = vmatprep.mubr.bf16.mxu1 %v3236_v12  ;;  %1714 = vmatprep.mubr.bf16.mxu0 %v3174_v13  ;;  %v3238_v12 = vcombine.high %v139_v6, %v143_v7  ;;  %v3176_v13 = vcombine.high %v76_v8, %v80_v9 }
  0xaa   :  { %1618 = vmatmul.mubr.bf16.gmra.mrb[68].mxu1 %v3235_v18  ;;  %1715 = vmatmul.mubr.bf16.gmra.mrb[68].mxu0 %v3173_v19  ;;  %v4092_v18 = vld [vmem:[%s5702_s3] sm:$0xff]   ;;  %v3237_v19 = vcombine.low %v139_v6, %v143_v7 }
  0xab   :  { %1625 = vmatprep.mubr.bf16.mxu1 %v3244_v20  ;;  %1722 = vmatprep.mubr.bf16.mxu0 %v3182_v21  ;;  %v3175_v20 = vcombine.low %v76_v8, %v80_v9  ;;  %v3246_v21 = vcombine.high %v147_v14, %v151_v15 }
  0xac   :  { %3868 = vmatprep.subr.bf16.mxu0 %v4092_v18 }
  0xad   :  { %3869 = vmatpush3.bf16.msra.mxu0 %v4092_v18  ;;  %v124_v18 = vld [vmem:[%s5701_s0 + $0x2d8] sm:$0xff] }
  0xae   :  { %3870 = vmatprep.subr.bf16.mxu0 %v4093_v31 }
  0xb1   :  { %3871 = vmatpush3.bf16.msra.mxu0 %v4093_v31 }
  0xb2   :  { %1626 = vmatmul.mubr.bf16.gmra.mrb[72].mxu1 %v3243_v26  ;;  %1723 = vmatmul.mubr.bf16.gmra.mrb[72].mxu0 %v3181_v27  ;;  %v96_v26 = vld [vmem:[%s5701_s0 + $0x1f8] sm:$0xff]  ;;  %v3245_v27 = vcombine.low %v147_v14, %v151_v15 }
  0xb3   :  { %1633 = vmatprep.mubr.bf16.mxu1 %v3252_v28  ;;  %1730 = vmatprep.mubr.bf16.mxu0 %v3190_v29  ;;  %v3183_v28 = vcombine.low %v84_v16, %v88_v17  ;;  %v3254_v29 = vcombine.high %v155_v23, %v159_v24  ;;  %v3192_v30 = vcombine.high %v92_v25, %v96_v26 }
  0xb4   :  { %v3191_v38 = vcombine.low %v92_v25, %v96_v26  ;;  %3872 = vmatprep.subr.bf16.mxu0 %v4094_v1 }
  0xb5   :  { %3873 = vmatpush3.bf16.msra.mxu0 %v4094_v1  ;;  %v144_v1 = vld [vmem:[%s5701_s0 + $0x378] sm:$0xff] }
  0xba   :  { %1634 = vmatmul.mubr.bf16.gmra.mrb[76].mxu1 %v3251_v34  ;;  %1731 = vmatmul.mubr.bf16.gmra.mrb[76].mxu0 %v3189_v35 }
  0xbb   :  { %1738 = vmatprep.mubr.bf16.mxu0 %v3198_v36  ;;  %1835 = vmatprep.mubr.bf16.mxu1 %v3136_v37  ;;  %v3253_v37 = vcombine.low %v155_v23, %v159_v24 }
  0xc2   :  { %1739 = vmatmul.mubr.bf16.gmra.mrb[80].mxu0 %v3197_v43  ;;  %1836 = vmatmul.mubr.bf16.vlgmr.msra.gmra.mrb[80].mxu1 %v3135_v42  ;;  %v3200_v42 = vcombine.high %v100_v32, %v104_v33 }
  0xc3   :  { %1746 = vmatprep.mubr.bf16.mxu0 %v3206_v44  ;;  %1843 = vmatprep.mubr.bf16.mxu1 %v3144_v45 }
  0xca   :  { %1747 = vmatmul.mubr.bf16.gmra.mrb[84].mxu0 %v3205_v50  ;;  %1844 = vmatmul.mubr.bf16.gmra.mrb[84].mxu1 %v3143_v51  ;;  %v112_v50 = vld [vmem:[%s5701_s0 + $0x278] sm:$0xff] }
  0xcb   :  { %1754 = vmatprep.mubr.bf16.mxu0 %v3214_v52  ;;  %1851 = vmatprep.mubr.bf16.mxu1 %v3152_v53  ;;  %v3207_v7 = vcombine.low %v108_v49, %v112_v50 }
  0xd2   :  { %1755 = vmatmul.mubr.bf16.gmra.mrb[88].mxu0 %v3213_v58  ;;  %1852 = vmatmul.mubr.bf16.gmra.mrb[88].mxu1 %v3151_v59  ;;  %v3208_v58 = vcombine.high %v108_v49, %v112_v50 }
  0xd3   :  { %1762 = vmatprep.mubr.bf16.mxu0 %v3222_v60  ;;  %1859 = vmatprep.mubr.bf16.mxu1 %v3160_v61 }
  0xda   :  { %1763 = vmatmul.mubr.bf16.gmra.mrb[92].mxu0 %v3221_v2  ;;  %1860 = vmatmul.mubr.bf16.gmra.mrb[92].mxu1 %v3159_v3  ;;  %v116_v2 = vld [vmem:[%s5701_s0 + $0x298] sm:$0xff] }
  0xdb   :  { %1770 = vmatprep.mubr.bf16.mxu0 %v3230_v4  ;;  %1867 = vmatprep.mubr.bf16.mxu1 %v3168_v5  ;;  %v120_v3 = vld [vmem:[%s5701_s0 + $0x2b8] sm:$0xff] }
  0xdc   :  { %v3215_v23 = vcombine.low %v116_v2, %v120_v3 }
  0xe2   :  { %1771 = vmatmul.mubr.bf16.gmra.mrb[96].mxu0 %v3229_v10  ;;  %1868 = vmatmul.mubr.bf16.gmra.mrb[96].mxu1 %v3167_v11  ;;  %v3216_v11 = vcombine.high %v116_v2, %v120_v3 }
  0xe3   :  { %1778 = vmatprep.mubr.bf16.mxu0 %v3238_v12  ;;  %1875 = vmatprep.mubr.bf16.mxu1 %v3176_v13 }
  0xea   :  { %1779 = vmatmul.mubr.bf16.gmra.mrb[100].mxu0 %v3237_v19  ;;  %1876 = vmatmul.mubr.bf16.gmra.mrb[100].mxu1 %v3175_v20  ;;  %v128_v19 = vld [vmem:[%s5701_s0 + $0x2f8] sm:$0xff] }
  0xeb   :  { %1786 = vmatprep.mubr.bf16.mxu0 %v3246_v21  ;;  %1883 = vmatprep.mubr.bf16.mxu1 %v3184_v22 }
  0xf2   :  { %1787 = vmatmul.mubr.bf16.gmra.mrb[104].mxu0 %v3245_v27  ;;  %1884 = vmatmul.mubr.bf16.gmra.mrb[104].mxu1 %v3183_v28  ;;  %v3224_v27 = vcombine.high %v124_v18, %v128_v19 }
  0xf3   :  { %1794 = vmatprep.mubr.bf16.mxu0 %v3254_v29  ;;  %1891 = vmatprep.mubr.bf16.mxu1 %v3192_v30 }
  0xf5   :  { %v3436_v34 = vpop.f32.mrb[0].mxu1  ;;  %v3364_v35 = vpop.f32.mrb[0].mxu0 }
  0xf6   :  { %v3437_v36 = vpop.f32.mrb[1].mxu1  ;;  %v3365_v39 = vpop.f32.mrb[1].mxu0 }
  0xf7   :  { %v4834_v40 = vadd.f32 %v3437_v36, %v3436_v34  ;;  %v3439_v41 = vpop.f32.mrb[2].mxu1  ;;  %v4836_v43 = vadd.f32 %v3365_v39, %v3364_v35  ;;  %v3367_v44 = vpop.f32.mrb[2].mxu0  ;;  %v4095_v34 = vld [vmem:[%s5702_s3 + $0x18] sm:$0xff]   ;;  %v4893_v35 = vld [vmem:[%s5703_s2] ss:$0 sm:$0xff] }
  0xf8   :  { %v3440_v45 = vpop.f32.mrb[3].mxu1  ;;  %v3368_v46 = vpop.f32.mrb[3].mxu0  ;;  %v132_v36 = vld [vmem:[%s5701_s0 + $0x318] sm:$0xff]  ;;  %3874 = vmatprep.subr.bf16.mxu0 %v4095_v34 }
  0xf9   :  { %v4838_v47 = vadd.f32 %v3440_v45, %v3439_v41  ;;  %v4840_v48 = vadd.f32 %v3368_v46, %v3367_v44  ;;  %v3223_v44 = vcombine.low %v124_v18, %v128_v19  ;;  %3875 = vmatpush3.bf16.msra.mxu0 %v4095_v34 }
  0xfa   :  { %1795 = vmatmul.mubr.bf16.gmra.mrb[108].mxu0 %v3253_v37  ;;  %1892 = vmatmul.mubr.bf16.gmra.mrb[108].mxu1 %v3191_v38  ;;  %v136_v37 = vld [vmem:[%s5701_s0 + $0x338] sm:$0xff]  ;;  %v1355_v38 = vadd.f32 %v4836_v43, %v4893_v35  ;;  %v4096_v43 = vld [vmem:[%s5702_s3 + $0x20] sm:$0xff]  }
  0xfb   :  { %1899 = vmatprep.mubr.bf16.mxu1 %v3200_v42  ;;  %v1358_v46 = vadd.f32 %v4840_v48, %v4893_v35  ;;  %3876 = vmatprep.subr.bf16.mxu0 %v4096_v43 }
  0xfd   :  { %v3442_v51 = vpop.f32.mrb[4].mxu1  ;;  %v3370_v52 = vpop.f32.mrb[4].mxu0  ;;  %3877 = vmatpush3.bf16.msra.mxu0 %v4096_v43 }
  0xfe   :  { %v3443_v53 = vpop.f32.mrb[5].mxu1  ;;  %v3371_v55 = vpop.f32.mrb[5].mxu0 }
  0xff   :  { %v4848_v56 = vadd.f32 %v3443_v53, %v3442_v51  ;;  %v3445_v57 = vpop.f32.mrb[6].mxu1  ;;  %v4850_v59 = vadd.f32 %v3371_v55, %v3370_v52  ;;  %v3373_v60 = vpop.f32.mrb[6].mxu0  ;;  %v3232_v51 = vcombine.high %v132_v36, %v136_v37 }
 0x100   :  { %v3446_v61 = vpop.f32.mrb[7].mxu1  ;;  %v3374_v62 = vpop.f32.mrb[7].mxu0 }
 0x101   :  { %v4852_v63 = vadd.f32 %v3446_v61, %v3445_v57  ;;  %v4854_v0 = vadd.f32 %v3374_v62, %v3373_v60  ;;  %v4097_v61 = vld [vmem:[%s5702_s3 + $0x28] sm:$0xff]   ;;  %v140_v62 = vld [vmem:[%s5701_s0 + $0x358] sm:$0xff]  ;;  %v1363_v2 = vadd.f32 %v4850_v59, %v4893_v35  ;;  %v4098_v59 = vld [vmem:[%s5702_s3 + $0x30] sm:$0xff]  }
 0x102   :  { %1900 = vmatmul.mubr.bf16.gmra.mrb[112].mxu1 %v3199_v54  ;;  %3878 = vmatprep.subr.bf16.mxu0 %v4097_v61  ;;  %v3239_v34 = vcombine.low %v140_v62, %v144_v1 }
 0x103   :  { %1907 = vmatprep.mubr.bf16.mxu1 %v3208_v58  ;;  %3879 = vmatpush3.bf16.msra.mxu0 %v4097_v61 }
 0x104   :  { %3880 = vmatprep.subr.bf16.mxu0 %v4098_v59 }
 0x105   :  { %v3448_v4 = vpop.f32.mrb[8].mxu1  ;;  %v3376_v5 = vpop.f32.mrb[8].mxu0 }
 0x106   :  { %v3449_v6 = vpop.f32.mrb[9].mxu1  ;;  %v3377_v8 = vpop.f32.mrb[9].mxu0 }
 0x107   :  { %v4865_v9 = vadd.f32 %v3449_v6, %v3448_v4  ;;  %v3451_v10 = vpop.f32.mrb[10].mxu1  ;;  %v4867_v12 = vadd.f32 %v3377_v8, %v3376_v5  ;;  %v3379_v13 = vpop.f32.mrb[10].mxu0  ;;  %v3231_v6 = vcombine.low %v132_v36, %v136_v37  ;;  %v1366_v8 = vadd.f32 %v4854_v0, %v4893_v35  ;;  %3881 = vmatpush3.bf16.msra.mxu0 %v4098_v59 }
 0x108   :  { %v3452_v14 = vpop.f32.mrb[11].mxu1  ;;  %v3380_v15 = vpop.f32.mrb[11].mxu0 }
 0x109   :  { %v4869_v16 = vadd.f32 %v3452_v14, %v3451_v10  ;;  %v4871_v17 = vadd.f32 %v3380_v15, %v3379_v13  ;;  %v3240_v13 = vcombine.high %v140_v62, %v144_v1 }
 0x10a   :  { %1908 = vmatmul.mubr.bf16.gmra.mrb[116].mxu1 %v3207_v7 }
 0x10b   :  { %1915 = vmatprep.mubr.bf16.mxu1 %v3216_v11  ;;  %v1374_v37 = vadd.f32 %v4871_v17, %v4893_v35  ;;  %v156_v17 = vld [vmem:[%s5701_s0 + $0x3d8] sm:$0xff] }
 0x10d   :  { %v3454_v20 = vpop.f32.mrb[12].mxu1  ;;  %v3382_v21 = vpop.f32.mrb[12].mxu0 }
 0x10e   :  { %v3455_v22 = vpop.f32.mrb[13].mxu1  ;;  %v3383_v24 = vpop.f32.mrb[13].mxu0 }
 0x10f   :  { %v4879_v25 = vadd.f32 %v3455_v22, %v3454_v20  ;;  %v3457_v26 = vpop.f32.mrb[14].mxu1  ;;  %v4881_v28 = vadd.f32 %v3383_v24, %v3382_v21  ;;  %v3385_v29 = vpop.f32.mrb[14].mxu0  ;;  %v148_v24 = vld [vmem:[%s5701_s0 + $0x398] sm:$0xff] }
 0x110   :  { %v3458_v30 = vpop.f32.mrb[15].mxu1  ;;  %v3386_v31 = vpop.f32.mrb[15].mxu0 }
 0x111   :  { %v4883_v32 = vadd.f32 %v3458_v30, %v3457_v26  ;;  %v4885_v33 = vadd.f32 %v3386_v31, %v3385_v29  ;;  %v152_v26 = vld [vmem:[%s5701_s0 + $0x3b8] sm:$0xff]  ;;  %v1379_v43 = vadd.f32 %v4881_v28, %v4893_v35 }
 0x112   :  { %1916 = vmatmul.mubr.bf16.gmra.mrb[120].mxu1 %v3215_v23  ;;  %v4099_v23 = vld [vmem:[%s5702_s3 + $0x38] sm:$0xff]   ;;  %v3247_v61 = vcombine.low %v148_v24, %v152_v26 }
 0x113   :  { %1923 = vmatprep.mubr.bf16.mxu1 %v3224_v27  ;;  %v1371_v27 = vadd.f32 %v4867_v12, %v4893_v35  ;;  %3882 = vmatprep.subr.bf16.mxu0 %v4099_v23  ;;  %v1382_v1 = vadd.f32 %v4885_v33, %v4893_v35 }
 0x114   :  { %3883 = vmatpush3.bf16.msra.mxu0 %v4099_v23 }
 0x115   :  { %v3476_v39 = vpop.f32.mrb[16].mxu1  ;;  %v3388_v41 = vpop.f32.mrb[16].mxu0 }
 0x116   :  { %v3477_v42 = vpop.f32.mrb[17].mxu1  ;;  %v3389_v45 = vpop.f32.mrb[17].mxu0 }
 0x117   :  { %v3478_v49 = vadd.f32 %v3477_v42, %v3476_v39  ;;  %v3479_v50 = vpop.f32.mrb[18].mxu1  ;;  %v4905_v52 = vadd.f32 %v3389_v45, %v3388_v41  ;;  %v3391_v53 = vpop.f32.mrb[18].mxu0  ;;  %v3248_v41 = vcombine.high %v148_v24, %v152_v26 }
 0x118   :  { %v3480_v54 = vpop.f32.mrb[19].mxu1  ;;  %v3392_v55 = vpop.f32.mrb[19].mxu0 }
 0x119   :  { %v4910_v57 = vadd.f32 %v3478_v49, %v1355_v38  ;;  %v3481_v58 = vadd.f32 %v3480_v54, %v3479_v50  ;;  %v4912_v60 = vadd.f32 %v3392_v55, %v3391_v53  ;;  %v160_v53 = vld [vmem:[%s5701_s0 + $0x3f8] sm:$0xff] }
 0x11a   :  { %1924 = vmatmul.mubr.bf16.gmra.mrb[124].mxu1 %v3223_v44 }
 0x11b   :  { %v4914_v48 = vadd.f32 %v3481_v58, %v1358_v46  ;;  %1931 = vmatprep.mubr.bf16.mxu1 %v3232_v51  ;;  %v1390_v23 = vadd.f32 %v4912_v60, %v4893_v35 }
 0x11d   :  { %v3482_v3 = vpop.f32.mrb[20].mxu1  ;;  %v3394_v4 = vpop.f32.mrb[20].mxu0 }
 0x11e   :  { %v3483_v5 = vpop.f32.mrb[21].mxu1  ;;  %v3395_v7 = vpop.f32.mrb[21].mxu0 }
 0x11f   :  { %v3484_v10 = vadd.f32 %v3483_v5, %v3482_v3  ;;  %v3485_v11 = vpop.f32.mrb[22].mxu1  ;;  %v4929_v14 = vadd.f32 %v3395_v7, %v3394_v4  ;;  %v3397_v15 = vpop.f32.mrb[22].mxu0  ;;  %v3256_v4 = vcombine.high %v156_v17, %v160_v53 }
 0x120   :  { %v3486_v18 = vpop.f32.mrb[23].mxu1  ;;  %v3398_v19 = vpop.f32.mrb[23].mxu0 }
 0x121   :  { %v4934_v20 = vadd.f32 %v3484_v10, %v1363_v2  ;;  %v3487_v21 = vadd.f32 %v3486_v18, %v3485_v11  ;;  %v4936_v22 = vadd.f32 %v3398_v19, %v3397_v15  ;;  %v1387_v15 = vadd.f32 %v4905_v52, %v4893_v35 }
 0x122   :  { %1932 = vmatmul.mubr.bf16.gmra.mrb[128].mxu1 %v3231_v6  ;;  %v3255_v19 = vcombine.low %v156_v17, %v160_v53 }
 0x123   :  { %v4938_v0 = vadd.f32 %v3487_v21, %v1366_v8  ;;  %1939 = vmatprep.mubr.bf16.mxu1 %v3240_v13 }
 0x125   :  { %v3488_v29 = vpop.f32.mrb[24].mxu1  ;;  %v3400_v30 = vpop.f32.mrb[24].mxu0 }
 0x126   :  { %v3489_v31 = vpop.f32.mrb[25].mxu1  ;;  %v3401_v36 = vpop.f32.mrb[25].mxu0 }
 0x127   :  { %v3490_v38 = vadd.f32 %v3489_v31, %v3488_v29  ;;  %v3491_v39 = vpop.f32.mrb[26].mxu1  ;;  %v4953_v42 = vadd.f32 %v3401_v36, %v3400_v30  ;;  %v3403_v44 = vpop.f32.mrb[26].mxu0 }
 0x128   :  { %v3492_v45 = vpop.f32.mrb[27].mxu1  ;;  %v3404_v46 = vpop.f32.mrb[27].mxu0 }
 0x129   :  { %v4955_v49 = vadd.f32 %v3490_v38, %v1371_v27  ;;  %v3493_v12 = vadd.f32 %v3492_v45, %v3491_v39  ;;  %v4957_v50 = vadd.f32 %v3404_v46, %v3403_v44  ;;  %v1395_v38 = vadd.f32 %v4929_v14, %v4893_v35 }
 0x12a   :  { %1940 = vmatmul.mubr.bf16.gmra.mrb[132].mxu1 %v3239_v34  ;;  %v1398_v45 = vadd.f32 %v4936_v22, %v4893_v35  ;;  %v1403_v14 = vadd.f32 %v4953_v42, %v4893_v35 }
 0x12b   :  { %v4959_v51 = vadd.f32 %v3493_v12, %v1374_v37  ;;  %1947 = vmatprep.mubr.bf16.mxu1 %v3248_v41  ;;  %v1406_v22 = vadd.f32 %v4957_v50, %v4893_v35 }
 0x12d   :  { %v3494_v54 = vpop.f32.mrb[28].mxu1  ;;  %v3406_v55 = vpop.f32.mrb[28].mxu0 }
 0x12e   :  { %v3495_v58 = vpop.f32.mrb[29].mxu1  ;;  %v3407_v62 = vpop.f32.mrb[29].mxu0 }
 0x12f   :  { %v3496_v2 = vadd.f32 %v3495_v58, %v3494_v54  ;;  %v3497_v3 = vpop.f32.mrb[30].mxu1  ;;  %v3408_v5 = vadd.f32 %v3407_v62, %v3406_v55  ;;  %v3409_v6 = vpop.f32.mrb[30].mxu0 }
 0x130   :  { %v3498_v7 = vpop.f32.mrb[31].mxu1  ;;  %v3410_v8 = vpop.f32.mrb[31].mxu0 }
 0x131   :  { %v4971_v10 = vadd.f32 %v3496_v2, %v1379_v43  ;;  %v3499_v11 = vadd.f32 %v3498_v7, %v3497_v3  ;;  %v3411_v13 = vadd.f32 %v3410_v8, %v3409_v6  ;;  %v1411_v42 = vadd.f32 %v3408_v5, %v4893_v35 }
 0x132   :  { %1948 = vmatmul.mubr.bf16.gmra.mrb[136].mxu1 %v3247_v61 }
 0x133   :  { %v4973_v28 = vadd.f32 %v3499_v11, %v1382_v1  ;;  %1955 = vmatprep.mubr.bf16.mxu1 %v3256_v4  ;;  %v1414_v50 = vadd.f32 %v3411_v13, %v4893_v35 }
 0x135   :  { %v3500_v59 = vpop.f32.mrb[32].mxu1  ;;  %v3412_v33 = vpop.f32.mrb[32].mxu0 }
 0x136   :  { %v3501_v18 = vpop.f32.mrb[33].mxu1  ;;  %v3413_v21 = vpop.f32.mrb[33].mxu0 }
 0x137   :  { %v3502_v24 = vadd.f32 %v3501_v18, %v3500_v59  ;;  %v3503_v26 = vpop.f32.mrb[34].mxu1  ;;  %v3414_v27 = vadd.f32 %v3413_v21, %v3412_v33  ;;  %v3415_v29 = vpop.f32.mrb[34].mxu0 }
 0x138   :  { %v3504_v30 = vpop.f32.mrb[35].mxu1  ;;  %v3416_v31 = vpop.f32.mrb[35].mxu0 }
 0x139   :  { %v4979_v34 = vadd.f32 %v3502_v24, %v1387_v15  ;;  %v3505_v36 = vadd.f32 %v3504_v30, %v3503_v26  ;;  %v3417_v37 = vadd.f32 %v3416_v31, %v3415_v29  ;;  %v1419_v5 = vadd.f32 %v3414_v27, %v4893_v35 }
 0x13a   :  { %1956 = vmatmul.mubr.bf16.gmra.mrb[140].mxu1 %v3255_v19 }
 0x13b   :  { %v4981_v52 = vadd.f32 %v3505_v36, %v1390_v23  ;;  %v1422_v13 = vadd.f32 %v3417_v37, %v4893_v35 }
 0x13d   :  { %v3506_v39 = vpop.f32.mrb[36].mxu1  ;;  %v3418_v41 = vpop.f32.mrb[36].mxu0 }
 0x13e   :  { %v3507_v44 = vpop.f32.mrb[37].mxu1  ;;  %v3419_v60 = vpop.f32.mrb[37].mxu0 }
 0x13f   :  { %v3508_v46 = vadd.f32 %v3507_v44, %v3506_v39  ;;  %v3509_v12 = vpop.f32.mrb[38].mxu1  ;;  %v3420_v17 = vadd.f32 %v3419_v60, %v3418_v41  ;;  %v3421_v53 = vpop.f32.mrb[38].mxu0 }
 0x140   :  { %v3510_v43 = vpop.f32.mrb[39].mxu1  ;;  %v3422_v54 = vpop.f32.mrb[39].mxu0 }
 0x141   :  { %v4987_v55 = vadd.f32 %v3508_v46, %v1395_v38  ;;  %v3511_v58 = vadd.f32 %v3510_v43, %v3509_v12  ;;  %v3423_v61 = vadd.f32 %v3422_v54, %v3421_v53  ;;  %v1427_v37 = vadd.f32 %v3420_v17, %v4893_v35 }
 0x143   :  { %v4989_v62 = vadd.f32 %v3511_v58, %v1398_v45 }
 0x145   :  { %v3512_v1 = vpop.f32.mrb[40].mxu1  ;;  %v3424_v2 = vpop.f32.mrb[40].mxu0 }
 0x146   :  { %v3513_v3 = vpop.f32.mrb[41].mxu1  ;;  %v3425_v4 = vpop.f32.mrb[41].mxu0 }
 0x147   :  { %v3514_v6 = vadd.f32 %v3513_v3, %v3512_v1  ;;  %v3515_v7 = vpop.f32.mrb[42].mxu1  ;;  %v3426_v8 = vadd.f32 %v3425_v4, %v3424_v2  ;;  %v3427_v11 = vpop.f32.mrb[42].mxu0 }
 0x148   :  { %v3516_v15 = vpop.f32.mrb[43].mxu1  ;;  %v3428_v59 = vpop.f32.mrb[43].mxu0 }
 0x149   :  { %v4995_v33 = vadd.f32 %v3514_v6, %v1403_v14  ;;  %v3517_v18 = vadd.f32 %v3516_v15, %v3515_v7  ;;  %v3429_v19 = vadd.f32 %v3428_v59, %v3427_v11 }
 0x14b   :  { %v4997_v21 = vadd.f32 %v3517_v18, %v1406_v22 }
 0x14d   :  { %v3518_v23 = vpop.f32.mrb[44].mxu1  ;;  %v3430_v24 = vpop.f32.mrb[44].mxu0 }
 0x14e   :  { %v3519_v26 = vpop.f32.mrb[45].mxu1  ;;  %v3431_v29 = vpop.f32.mrb[45].mxu0 }
 0x14f   :  { %v3520_v30 = vadd.f32 %v3519_v26, %v3518_v23  ;;  %v3521_v31 = vpop.f32.mrb[46].mxu1  ;;  %v3432_v36 = vadd.f32 %v3431_v29, %v3430_v24  ;;  %v3433_v38 = vpop.f32.mrb[46].mxu0  ;;  %v1430_v24 = vadd.f32 %v3423_v61, %v4893_v35  ;;  %v1435_v61 = vadd.f32 %v3426_v8, %v4893_v35 }
 0x150   :  { %v3522_v39 = vpop.f32.mrb[47].mxu1  ;;  %v3434_v41 = vpop.f32.mrb[47].mxu0 }
 0x151   :  { %v5001_v44 = vadd.f32 %v3520_v30, %v1411_v42  ;;  %v3523_v60 = vadd.f32 %v3522_v39, %v3521_v31  ;;  %v3435_v45 = vadd.f32 %v3434_v41, %v3433_v38 }
 0x153   :  { %v5003_v46 = vadd.f32 %v3523_v60, %v1414_v50 }
 0x155   :  { %v3524_v12 = vpop.f32.mrb[48].mxu1  ;;  %v3588_v53 = vpop.f32.mrb[48].mxu0 }
 0x156   :  { %v3525_v43 = vpop.f32.mrb[49].mxu1  ;;  %v3589_v54 = vpop.f32.mrb[49].mxu0 }
 0x157   :  { %v3526_v58 = vadd.f32 %v3525_v43, %v3524_v12  ;;  %v3590_v14 = vadd.f32 %v3589_v54, %v3588_v53  ;;  %v3527_v1 = vpop.f32.mrb[50].mxu1  ;;  %v3591_v2 = vpop.f32.mrb[50].mxu0  ;;  %v1438_v54 = vadd.f32 %v3429_v19, %v4893_v35  ;;  %v1443_v19 = vadd.f32 %v3432_v36, %v4893_v35 }
 0x158   :  { %v3528_v3 = vpop.f32.mrb[51].mxu1  ;;  %v3592_v4 = vpop.f32.mrb[51].mxu0 }
 0x159   :  { %v5007_v22 = vadd.f32 %v3526_v58, %v1419_v5  ;;  %v5010_v6 = vadd.f32 %v3590_v14, %v4910_v57  ;;  %v3529_v7 = vadd.f32 %v3528_v3, %v3527_v1  ;;  %v3593_v11 = vadd.f32 %v3592_v4, %v3591_v2 }
 0x15b   :  { %v5012_v27 = vadd.f32 %v3529_v7, %v1422_v13  ;;  %v5015_v15 = vadd.f32 %v3593_v11, %v4914_v48 }
 0x15d   :  { %v3530_v59 = vpop.f32.mrb[52].mxu1  ;;  %v3594_v18 = vpop.f32.mrb[52].mxu0 }
 0x15e   :  { %v3531_v42 = vpop.f32.mrb[53].mxu1  ;;  %v3595_v23 = vpop.f32.mrb[53].mxu0 }
 0x15f   :  { %v3532_v26 = vadd.f32 %v3531_v42, %v3530_v59  ;;  %v3596_v29 = vadd.f32 %v3595_v23, %v3594_v18  ;;  %v3533_v50 = vpop.f32.mrb[54].mxu1  ;;  %v3597_v57 = vpop.f32.mrb[54].mxu0  ;;  %v1446_v23 = vadd.f32 %v3435_v45, %v4893_v35 }
 0x160   :  { %v3534_v30 = vpop.f32.mrb[55].mxu1  ;;  %v3598_v31 = vpop.f32.mrb[55].mxu0 }
 0x161   :  { %v5019_v38 = vadd.f32 %v3532_v26, %v1427_v37  ;;  %v5022_v39 = vadd.f32 %v3596_v29, %v4934_v20  ;;  %v3535_v48 = vadd.f32 %v3534_v30, %v3533_v50  ;;  %v3599_v41 = vadd.f32 %v3598_v31, %v3597_v57 }
 0x163   :  { %v5024_v17 = vadd.f32 %v3535_v48, %v1430_v24  ;;  %v5027_v60 = vadd.f32 %v3599_v41, %v4938_v0 }
 0x165   :  { %v3536_v5 = vpop.f32.mrb[56].mxu1  ;;  %v3600_v12 = vpop.f32.mrb[56].mxu0 }
 0x166   :  { %v3537_v53 = vpop.f32.mrb[57].mxu1  ;;  %v3601_v43 = vpop.f32.mrb[57].mxu0 }
 0x167   :  { %v3538_v13 = vadd.f32 %v3537_v53, %v3536_v5  ;;  %v3602_v58 = vadd.f32 %v3601_v43, %v3600_v12  ;;  %v3539_v14 = vpop.f32.mrb[58].mxu1  ;;  %v3603_v20 = vpop.f32.mrb[58].mxu0  ;;  %v1451_v53 = vadd.f32 %v4834_v40, %v4893_v35 }
 0x168   :  { %v3540_v1 = vpop.f32.mrb[59].mxu1  ;;  %v3604_v2 = vpop.f32.mrb[59].mxu0 }
 0x169   :  { %v5031_v3 = vadd.f32 %v3538_v13, %v1435_v61  ;;  %v5034_v4 = vadd.f32 %v3602_v58, %v4955_v49  ;;  %v3541_v0 = vadd.f32 %v3540_v1, %v3539_v14  ;;  %v3605_v7 = vadd.f32 %v3604_v2, %v3603_v20 }
 0x16b   :  { %v5036_v8 = vadd.f32 %v3541_v0, %v1438_v54  ;;  %v5039_v11 = vadd.f32 %v3605_v7, %v4959_v51 }
 0x16d   :  { %v3542_v37 = vpop.f32.mrb[60].mxu1  ;;  %v3606_v59 = vpop.f32.mrb[60].mxu0 }
 0x16e   :  { %v3543_v18 = vpop.f32.mrb[61].mxu1  ;;  %v3607_v42 = vpop.f32.mrb[61].mxu0 }
 0x16f   :  { %v3544_v24 = vadd.f32 %v3543_v18, %v3542_v37  ;;  %v3608_v26 = vadd.f32 %v3607_v42, %v3606_v59  ;;  %v3545_v29 = vpop.f32.mrb[62].mxu1  ;;  %v3609_v49 = vpop.f32.mrb[62].mxu0 }
 0x170   :  { %v3546_v50 = vpop.f32.mrb[63].mxu1  ;;  %v3610_v57 = vpop.f32.mrb[63].mxu0 }
 0x171   :  { %v5043_v30 = vadd.f32 %v3544_v24, %v1443_v19  ;;  %v5046_v31 = vadd.f32 %v3608_v26, %v4971_v10  ;;  %v3547_v51 = vadd.f32 %v3546_v50, %v3545_v29  ;;  %v3611_v48 = vadd.f32 %v3610_v57, %v3609_v49 }
 0x172   :  { %v1454_v10 = vadd.f32 %v4838_v47, %v4893_v35  ;;  %v1459_v47 = vadd.f32 %v4848_v56, %v4893_v35 }
 0x173   :  { %v5048_v36 = vadd.f32 %v3547_v51, %v1446_v23  ;;  %v5051_v41 = vadd.f32 %v3611_v48, %v4973_v28 }
 0x175   :  { %v3548_v61 = vpop.f32.mrb[64].mxu1  ;;  %v3612_v45 = vpop.f32.mrb[64].mxu0 }
 0x176   :  { %v3549_v5 = vpop.f32.mrb[65].mxu1  ;;  %v3613_v12 = vpop.f32.mrb[65].mxu0 }
 0x177   :  { %v3550_v43 = vadd.f32 %v3549_v5, %v3548_v61  ;;  %v3614_v54 = vadd.f32 %v3613_v12, %v3612_v45  ;;  %v3551_v13 = vpop.f32.mrb[66].mxu1  ;;  %v3615_v58 = vpop.f32.mrb[66].mxu0 }
 0x178   :  { %v3552_v14 = vpop.f32.mrb[67].mxu1  ;;  %v3616_v20 = vpop.f32.mrb[67].mxu0 }
 0x179   :  { %v5057_v1 = vadd.f32 %v3550_v43, %v1451_v53  ;;  %v5060_v28 = vadd.f32 %v3614_v54, %v4979_v34  ;;  %v3553_v2 = vadd.f32 %v3552_v14, %v3551_v13  ;;  %v3617_v0 = vadd.f32 %v3616_v20, %v3615_v58 }
 0x17a   :  { %v1462_v34 = vadd.f32 %v4852_v63, %v4893_v35  ;;  %v1467_v63 = vadd.f32 %v4865_v9, %v4893_v35 }
 0x17b   :  { %v5062_v7 = vadd.f32 %v3553_v2, %v1454_v10  ;;  %v5065_v40 = vadd.f32 %v3617_v0, %v4981_v52 }
 0x17d   :  { %v3554_v19 = vpop.f32.mrb[68].mxu1  ;;  %v3618_v37 = vpop.f32.mrb[68].mxu0 }
 0x17e   :  { %v3555_v59 = vpop.f32.mrb[69].mxu1  ;;  %v3619_v18 = vpop.f32.mrb[69].mxu0 }
 0x17f   :  { %v3556_v42 = vadd.f32 %v3555_v59, %v3554_v19  ;;  %v3620_v23 = vadd.f32 %v3619_v18, %v3618_v37  ;;  %v3557_v24 = vpop.f32.mrb[70].mxu1  ;;  %v3621_v26 = vpop.f32.mrb[70].mxu0 }
 0x180   :  { %v3558_v29 = vpop.f32.mrb[71].mxu1  ;;  %v3622_v49 = vpop.f32.mrb[71].mxu0 }
 0x181   :  { %v5071_v50 = vadd.f32 %v3556_v42, %v1459_v47  ;;  %v5074_v52 = vadd.f32 %v3620_v23, %v4987_v55  ;;  %v3559_v57 = vadd.f32 %v3558_v29, %v3557_v24  ;;  %v3623_v51 = vadd.f32 %v3622_v49, %v3621_v26 }
 0x182   :  { %v1470_v55 = vadd.f32 %v4869_v16, %v4893_v35  ;;  %v1475_v16 = vadd.f32 %v4879_v25, %v4893_v35 }
 0x183   :  { %v5076_v48 = vadd.f32 %v3559_v57, %v1462_v34  ;;  %v5079_v56 = vadd.f32 %v3623_v51, %v4989_v62 }
 0x185   :  { %v3560_v61 = vpop.f32.mrb[72].mxu1  ;;  %v3624_v45 = vpop.f32.mrb[72].mxu0 }
 0x186   :  { %v3561_v5 = vpop.f32.mrb[73].mxu1  ;;  %v3625_v12 = vpop.f32.mrb[73].mxu0 }
 0x187   :  { %v3562_v53 = vadd.f32 %v3561_v5, %v3560_v61  ;;  %v3626_v43 = vadd.f32 %v3625_v12, %v3624_v45  ;;  %v3563_v54 = vpop.f32.mrb[74].mxu1  ;;  %v3627_v13 = vpop.f32.mrb[74].mxu0 }
 0x188   :  { %v3564_v58 = vpop.f32.mrb[75].mxu1  ;;  %v3628_v10 = vpop.f32.mrb[75].mxu0 }
 0x189   :  { %v5085_v14 = vadd.f32 %v3562_v53, %v1467_v63  ;;  %v5088_v62 = vadd.f32 %v3626_v43, %v4995_v33  ;;  %v3565_v20 = vadd.f32 %v3564_v58, %v3563_v54  ;;  %v3629_v2 = vadd.f32 %v3628_v10, %v3627_v13 }
 0x18a   :  { %v1478_v33 = vadd.f32 %v4883_v32, %v4893_v35 }
 0x18b   :  { %v5090_v0 = vadd.f32 %v3565_v20, %v1470_v55  ;;  %v5093_v9 = vadd.f32 %v3629_v2, %v4997_v21  ;;  %v4101_v2 = vld [vmem:[%s5704_s5 + $0x8] sm:$0xff]  }
 0x18d   :  { %v3566_v19 = vpop.f32.mrb[76].mxu1  ;;  %v3630_v37 = vpop.f32.mrb[76].mxu0 }
 0x18e   :  { %v3567_v59 = vpop.f32.mrb[77].mxu1  ;;  %v3631_v18 = vpop.f32.mrb[77].mxu0 }
 0x18f   :  { %v3568_v47 = vadd.f32 %v3567_v59, %v3566_v19  ;;  %v3632_v42 = vadd.f32 %v3631_v18, %v3630_v37  ;;  %v3569_v23 = vpop.f32.mrb[78].mxu1  ;;  %v3633_v24 = vpop.f32.mrb[78].mxu0 }
 0x190   :  { %v3570_v26 = vpop.f32.mrb[79].mxu1  ;;  %v3634_v34 = vpop.f32.mrb[79].mxu0 }
 0x191   :  { %v5099_v29 = vadd.f32 %v3568_v47, %v1475_v16  ;;  %v5102_v21 = vadd.f32 %v3632_v42, %v5001_v44  ;;  %v3571_v49 = vadd.f32 %v3570_v26, %v3569_v23  ;;  %v3635_v57 = vadd.f32 %v3634_v34, %v3633_v24 }
 0x193   :  { %v5104_v51 = vadd.f32 %v3571_v49, %v1478_v33  ;;  %v5107_v25 = vadd.f32 %v3635_v57, %v5003_v46  ;;  %v4100_v46 = vld [vmem:[%s5704_s5] sm:$0xff]  }
 0x194   :  { %3916 = vmatprep.subr.bf16.mxu1 %v4100_v46 }
 0x195   :  { %v3636_v61 = vpop.f32.mrb[80].mxu0  ;;  %v3700_v45 = vpop.f32.mrb[80].mxu1  ;;  %3917 = vmatpush3.bf16.msra.mxu1 %v4100_v46 }
 0x196   :  { %v3637_v5 = vpop.f32.mrb[81].mxu0  ;;  %v3701_v12 = vpop.f32.mrb[81].mxu1  ;;  %3918 = vmatprep.subr.bf16.mxu1 %v4101_v2 }
 0x197   :  { %v3638_v63 = vadd.f32 %v3637_v5, %v3636_v61  ;;  %v3702_v32 = vadd.f32 %v3701_v12, %v3700_v45  ;;  %v3639_v35 = vpop.f32.mrb[82].mxu0  ;;  %v3703_v53 = vpop.f32.mrb[82].mxu1  ;;  %v4103_v5 = vld [vmem:[%s5704_s5 + $0x18] sm:$0xff]  }
 0x198   :  { %v3640_v43 = vpop.f32.mrb[83].mxu0  ;;  %v3704_v54 = vpop.f32.mrb[83].mxu1 }
 0x199   :  { %v5110_v44 = vadd.f32 %v3638_v63, %v5007_v22  ;;  %v1838_v13 = vadd.f32 %v3702_v32, %v5010_v6  ;;  %v3641_v55 = vadd.f32 %v3640_v43, %v3639_v35  ;;  %v3705_v58 = vadd.f32 %v3704_v54, %v3703_v53  ;;  %3919 = vmatpush3.bf16.msra.mxu1 %v4101_v2 }
 0x19b   :  { %v5117_v10 = vadd.f32 %v3641_v55, %v5012_v27  ;;  %v1841_v20 = vadd.f32 %v3705_v58, %v5015_v15  ;;  %v1964_v22 = vmax.f32 %v1838_v13, 0.0  ;;  %v4102_v15 = vld [vmem:[%s5704_s5 + $0x10] sm:$0xff]  }
 0x19c   :  { %3920 = vmatprep.subr.bf16.mxu1 %v4102_v15 }
 0x19d   :  { %v1965_v19 = vmax.f32 %v1841_v20, 0.0  ;;  %v3642_v37 = vpop.f32.mrb[84].mxu0  ;;  %v3706_v6 = vpop.f32.mrb[84].mxu1  ;;  %3921 = vmatpush3.bf16.msra.mxu1 %v4102_v15 }
 0x19e   :  { %v3643_v59 = vpop.f32.mrb[85].mxu0  ;;  %v3707_v18 = vpop.f32.mrb[85].mxu1  ;;  %3922 = vmatprep.subr.bf16.mxu1 %v4103_v5 }
 0x19f   :  { %v3644_v16 = vadd.f32 %v3643_v59, %v3642_v37  ;;  %v3708_v47 = vadd.f32 %v3707_v18, %v3706_v6  ;;  %v3645_v42 = vpop.f32.mrb[86].mxu0  ;;  %v3709_v27 = vpop.f32.mrb[86].mxu1  ;;  %v1996_v23 = vpack.c.bf16 %v1965_v19, %v1964_v22  ;;  %v4105_v6 = vld [vmem:[%s5704_s5 + $0x28] sm:$0xff]  }
 0x1a0   :  { %v3646_v24 = vpop.f32.mrb[87].mxu0  ;;  %v3710_v33 = vpop.f32.mrb[87].mxu1 }
 0x1a1   :  { %v5127_v26 = vadd.f32 %v3644_v16, %v5019_v38  ;;  %v1846_v34 = vadd.f32 %v3708_v47, %v5022_v39  ;;  %v3647_v49 = vadd.f32 %v3646_v24, %v3645_v42  ;;  %v3711_v57 = vadd.f32 %v3710_v33, %v3709_v27  ;;  %3884 = vmatprep.mubr.bf16.mxu0 %v1996_v23 }
 0x1a2   :  { %3923 = vmatpush3.bf16.msra.mxu1 %v4103_v5 }
 0x1a3   :  { %v5131_v61 = vadd.f32 %v3647_v49, %v5024_v17  ;;  %v1849_v45 = vadd.f32 %v3711_v57, %v5027_v60  ;;  %v1966_v12 = vmax.f32 %v1846_v34, 0.0  ;;  %v4104_v60 = vld [vmem:[%s5704_s5 + $0x20] sm:$0xff]  }
 0x1a4   :  { %3924 = vmatprep.subr.bf16.mxu1 %v4104_v60 }
 0x1a5   :  { %v1967_v63 = vmax.f32 %v1849_v45, 0.0  ;;  %v3648_v38 = vpop.f32.mrb[88].mxu0  ;;  %v3712_v32 = vpop.f32.mrb[88].mxu1 }
 0x1a6   :  { %v3649_v35 = vpop.f32.mrb[89].mxu0  ;;  %v3713_v39 = vpop.f32.mrb[89].mxu1  ;;  %3925 = vmatpush3.bf16.msra.mxu1 %v4104_v60 }
 0x1a7   :  { %v1997_v53 = vpack.c.bf16 %v1967_v63, %v1966_v12  ;;  %v3650_v43 = vadd.f32 %v3649_v35, %v3648_v38  ;;  %v3714_v54 = vadd.f32 %v3713_v39, %v3712_v32  ;;  %v3651_v13 = vpop.f32.mrb[90].mxu0  ;;  %v3715_v17 = vpop.f32.mrb[90].mxu1  ;;  %3926 = vmatprep.subr.bf16.mxu1 %v4105_v6 }
 0x1a8   :  { %v3652_v55 = vpop.f32.mrb[91].mxu0  ;;  %v3716_v58 = vpop.f32.mrb[91].mxu1 }
 0x1a9   :  { %v5141_v46 = vadd.f32 %v3650_v43, %v5031_v3  ;;  %v1854_v20 = vadd.f32 %v3714_v54, %v5034_v4  ;;  %v3653_v2 = vadd.f32 %v3652_v55, %v3651_v13  ;;  %v3717_v22 = vadd.f32 %v3716_v58, %v3715_v17  ;;  %3885 = vmatmul.mubr.bf16.vlgmr.msra.gmra.mrb[112].mxu0 %v1997_v53 }
 0x1aa   :  { %3927 = vmatpush3.bf16.msra.mxu1 %v4105_v6 }
 0x1ab   :  { %v5145_v19 = vadd.f32 %v3653_v2, %v5036_v8  ;;  %v1857_v37 = vadd.f32 %v3717_v22, %v5039_v11  ;;  %v1968_v59 = vmax.f32 %v1854_v20, 0.0 }
 0x1ad   :  { %v1969_v18 = vmax.f32 %v1857_v37, 0.0  ;;  %v3654_v3 = vpop.f32.mrb[92].mxu0  ;;  %v3718_v16 = vpop.f32.mrb[92].mxu1 }
 0x1ae   :  { %v3655_v47 = vpop.f32.mrb[93].mxu0  ;;  %v3719_v4 = vpop.f32.mrb[93].mxu1 }
 0x1af   :  { %v3656_v42 = vadd.f32 %v3655_v47, %v3654_v3  ;;  %v3720_v27 = vadd.f32 %v3719_v4, %v3718_v16  ;;  %v3657_v23 = vpop.f32.mrb[94].mxu0  ;;  %v3721_v15 = vpop.f32.mrb[94].mxu1  ;;  %v1998_v8 = vpack.c.bf16 %v1969_v18, %v1968_v59 }
 0x1b0   :  { %v3658_v24 = vpop.f32.mrb[95].mxu0  ;;  %v3722_v11 = vpop.f32.mrb[95].mxu1 }
 0x1b1   :  { %v5152_v33 = vadd.f32 %v3656_v42, %v5043_v30  ;;  %v1862_v34 = vadd.f32 %v3720_v27, %v5046_v31  ;;  %v3659_v49 = vadd.f32 %v3658_v24, %v3657_v23  ;;  %v3723_v57 = vadd.f32 %v3722_v11, %v3721_v15  ;;  %3888 = vmatprep.mubr.bf16.mxu0 %v1998_v8 }
 0x1b3   :  { %v5156_v45 = vadd.f32 %v3659_v49, %v5048_v36  ;;  %v1865_v5 = vadd.f32 %v3723_v57, %v5051_v41  ;;  %v1970_v12 = vmax.f32 %v1862_v34, 0.0 }
 0x1b5   :  { %v1971_v63 = vmax.f32 %v1865_v5, 0.0  ;;  %v3660_v38 = vpop.f32.mrb[96].mxu0  ;;  %v3724_v32 = vpop.f32.mrb[96].mxu1 }
 0x1b6   :  { %v3661_v35 = vpop.f32.mrb[97].mxu0  ;;  %v3725_v39 = vpop.f32.mrb[97].mxu1 }
 0x1b7   :  { %v3662_v53 = vadd.f32 %v3661_v35, %v3660_v38  ;;  %v3726_v30 = vadd.f32 %v3725_v39, %v3724_v32  ;;  %v3663_v43 = vpop.f32.mrb[98].mxu0  ;;  %v3727_v54 = vpop.f32.mrb[98].mxu1  ;;  %v1999_v31 = vpack.c.bf16 %v1971_v63, %v1970_v12 }
 0x1b8   :  { %v3664_v13 = vpop.f32.mrb[99].mxu0  ;;  %v3728_v17 = vpop.f32.mrb[99].mxu1 }
 0x1b9   :  { %v5160_v60 = vadd.f32 %v3662_v53, %v5057_v1  ;;  %v1870_v36 = vadd.f32 %v3726_v30, %v5060_v28  ;;  %v3665_v55 = vadd.f32 %v3664_v13, %v3663_v43  ;;  %v3729_v41 = vadd.f32 %v3728_v17, %v3727_v54  ;;  %3889 = vmatmul.mubr.bf16.gmra.mrb[116].mxu0 %v1999_v31 }
 0x1bb   :  { %v5164_v58 = vadd.f32 %v3665_v55, %v5062_v7  ;;  %v1873_v20 = vadd.f32 %v3729_v41, %v5065_v40  ;;  %v1972_v2 = vmax.f32 %v1870_v36, 0.0 }
 0x1bd   :  { %v1973_v22 = vmax.f32 %v1873_v20, 0.0  ;;  %v3666_v37 = vpop.f32.mrb[100].mxu0  ;;  %v3730_v6 = vpop.f32.mrb[100].mxu1 }
 0x1be   :  { %v3667_v59 = vpop.f32.mrb[101].mxu0  ;;  %v3731_v18 = vpop.f32.mrb[101].mxu1 }
 0x1bf   :  { %v3668_v3 = vadd.f32 %v3667_v59, %v3666_v37  ;;  %v3732_v16 = vadd.f32 %v3731_v18, %v3730_v6  ;;  %v3669_v1 = vpop.f32.mrb[102].mxu0  ;;  %v3733_v47 = vpop.f32.mrb[102].mxu1  ;;  %v2000_v4 = vpack.c.bf16 %v1973_v22, %v1972_v2 }
 0x1c0   :  { %v3670_v28 = vpop.f32.mrb[103].mxu0  ;;  %v3734_v42 = vpop.f32.mrb[103].mxu1 }
 0x1c1   :  { %v5168_v27 = vadd.f32 %v3668_v3, %v5071_v50  ;;  %v1878_v7 = vadd.f32 %v3732_v16, %v5074_v52  ;;  %v3671_v23 = vadd.f32 %v3670_v28, %v3669_v1  ;;  %v3735_v40 = vadd.f32 %v3734_v42, %v3733_v47  ;;  %3892 = vmatprep.mubr.bf16.mxu0 %v2000_v4 }
 0x1c3   :  { %v5172_v15 = vadd.f32 %v3671_v23, %v5076_v48  ;;  %v1881_v8 = vadd.f32 %v3735_v40, %v5079_v56  ;;  %v1974_v24 = vmax.f32 %v1878_v7, 0.0 }
 0x1c5   :  { %v1975_v11 = vmax.f32 %v1881_v8, 0.0  ;;  %v3672_v34 = vpop.f32.mrb[104].mxu0  ;;  %v3736_v49 = vpop.f32.mrb[104].mxu1 }
 0x1c6   :  { %v3673_v57 = vpop.f32.mrb[105].mxu0  ;;  %v3737_v5 = vpop.f32.mrb[105].mxu1 }
 0x1c7   :  { %v3674_v12 = vadd.f32 %v3673_v57, %v3672_v34  ;;  %v3738_v63 = vadd.f32 %v3737_v5, %v3736_v49  ;;  %v3675_v50 = vpop.f32.mrb[106].mxu0  ;;  %v3739_v38 = vpop.f32.mrb[106].mxu1  ;;  %v2001_v32 = vpack.c.bf16 %v1975_v11, %v1974_v24 }
 0x1c8   :  { %v3676_v52 = vpop.f32.mrb[107].mxu0  ;;  %v3740_v35 = vpop.f32.mrb[107].mxu1 }
 0x1c9   :  { %v5176_v39 = vadd.f32 %v3674_v12, %v5085_v14  ;;  %v1886_v48 = vadd.f32 %v3738_v63, %v5088_v62  ;;  %v3677_v53 = vadd.f32 %v3676_v52, %v3675_v50  ;;  %v3741_v56 = vadd.f32 %v3740_v35, %v3739_v38  ;;  %3893 = vmatmul.mubr.bf16.gmra.mrb[120].mxu0 %v2001_v32 }
 0x1cb   :  { %v5180_v30 = vadd.f32 %v3677_v53, %v5090_v0  ;;  %v1889_v43 = vadd.f32 %v3741_v56, %v5093_v9  ;;  %v1976_v54 = vmax.f32 %v1886_v48, 0.0 }
 0x1cd   :  { %v1977_v31 = vmax.f32 %v1889_v43, 0.0  ;;  %v3678_v13 = vpop.f32.mrb[108].mxu0  ;;  %v3742_v17 = vpop.f32.mrb[108].mxu1 }
 0x1ce   :  { %v3679_v36 = vpop.f32.mrb[109].mxu0  ;;  %v3743_v55 = vpop.f32.mrb[109].mxu1 }
 0x1cf   :  { %v3680_v41 = vadd.f32 %v3679_v36, %v3678_v13  ;;  %v3744_v20 = vadd.f32 %v3743_v55, %v3742_v17  ;;  %v3681_v14 = vpop.f32.mrb[110].mxu0  ;;  %v3745_v2 = vpop.f32.mrb[110].mxu1  ;;  %v2002_v22 = vpack.c.bf16 %v1977_v31, %v1976_v54 }
 0x1d0   :  { %v3682_v62 = vpop.f32.mrb[111].mxu0  ;;  %v3746_v37 = vpop.f32.mrb[111].mxu1 }
 0x1d1   :  { %v5184_v6 = vadd.f32 %v3680_v41, %v5099_v29  ;;  %v1894_v0 = vadd.f32 %v3744_v20, %v5102_v21  ;;  %v3683_v59 = vadd.f32 %v3682_v62, %v3681_v14  ;;  %v3747_v9 = vadd.f32 %v3746_v37, %v3745_v2  ;;  %3896 = vmatprep.mubr.bf16.mxu0 %v2002_v22 }
 0x1d3   :  { %v5188_v18 = vadd.f32 %v3683_v59, %v5104_v51  ;;  %v1897_v3 = vadd.f32 %v3747_v9, %v5107_v25  ;;  %v1978_v16 = vmax.f32 %v1894_v0, 0.0 }
 0x1d5   :  { %v1979_v1 = vmax.f32 %v1897_v3, 0.0  ;;  %v3748_v47 = vpop.f32.mrb[112].mxu1 }
 0x1d6   :  { %v3749_v4 = vpop.f32.mrb[113].mxu1 }
 0x1d7   :  { %v3750_v28 = vadd.f32 %v3749_v4, %v3748_v47  ;;  %v3751_v42 = vpop.f32.mrb[114].mxu1  ;;  %v2003_v7 = vpack.c.bf16 %v1979_v1, %v1978_v16 }
 0x1d8   :  { %v3752_v23 = vpop.f32.mrb[115].mxu1 }
 0x1d9   :  { %v1902_v29 = vadd.f32 %v3750_v28, %v5110_v44  ;;  %v3753_v40 = vadd.f32 %v3752_v23, %v3751_v42  ;;  %3897 = vmatmul.mubr.bf16.gmra.mrb[124].mxu0 %v2003_v7 }
 0x1db   :  { %v1905_v21 = vadd.f32 %v3753_v40, %v5117_v10  ;;  %v1980_v8 = vmax.f32 %v1902_v29, 0.0 }
 0x1dd   :  { %v1981_v24 = vmax.f32 %v1905_v21, 0.0  ;;  %v3754_v51 = vpop.f32.mrb[116].mxu1 }
 0x1de   :  { %v3755_v11 = vpop.f32.mrb[117].mxu1 }
 0x1df   :  { %v3756_v34 = vadd.f32 %v3755_v11, %v3754_v51  ;;  %v3757_v25 = vpop.f32.mrb[118].mxu1  ;;  %v2004_v49 = vpack.c.bf16 %v1981_v24, %v1980_v8 }
 0x1e0   :  { %v3758_v57 = vpop.f32.mrb[119].mxu1 }
 0x1e1   :  { %v1910_v5 = vadd.f32 %v3756_v34, %v5127_v26  ;;  %v3759_v12 = vadd.f32 %v3758_v57, %v3757_v25  ;;  %3900 = vmatprep.mubr.bf16.mxu0 %v2004_v49 }
 0x1e3   :  { %v1913_v63 = vadd.f32 %v3759_v12, %v5131_v61  ;;  %v1982_v50 = vmax.f32 %v1910_v5, 0.0 }
 0x1e5   :  { %v1983_v44 = vmax.f32 %v1913_v63, 0.0  ;;  %v3760_v38 = vpop.f32.mrb[120].mxu1 }
 0x1e6   :  { %v3761_v32 = vpop.f32.mrb[121].mxu1 }
 0x1e7   :  { %v3762_v52 = vadd.f32 %v3761_v32, %v3760_v38  ;;  %v3763_v10 = vpop.f32.mrb[122].mxu1  ;;  %v2005_v35 = vpack.c.bf16 %v1983_v44, %v1982_v50 }
 0x1e8   :  { %v3764_v48 = vpop.f32.mrb[123].mxu1 }
 0x1e9   :  { %v1918_v53 = vadd.f32 %v3762_v52, %v5141_v46  ;;  %v3765_v56 = vadd.f32 %v3764_v48, %v3763_v10  ;;  %3901 = vmatmul.mubr.bf16.gmra.mrb[128].mxu0 %v2005_v35 }
 0x1eb   :  { %v1921_v43 = vadd.f32 %v3765_v56, %v5145_v19  ;;  %v1984_v54 = vmax.f32 %v1918_v53, 0.0 }
 0x1ed   :  { %v1985_v26 = vmax.f32 %v1921_v43, 0.0  ;;  %v3766_v31 = vpop.f32.mrb[124].mxu1  ;;  %v4109_v43 = vld [vmem:[%s5706_s7 + $0x8] sm:$0xff]  }
 0x1ee   :  { %v3767_v13 = vpop.f32.mrb[125].mxu1 }
 0x1ef   :  { %v3768_v17 = vadd.f32 %v3767_v13, %v3766_v31  ;;  %v3769_v61 = vpop.f32.mrb[126].mxu1  ;;  %v2006_v36 = vpack.c.bf16 %v1985_v26, %v1984_v54  ;;  %v4110_v54 = vld [vmem:[%s5706_s7 + $0x10] sm:$0xff]  }
 0x1f0   :  { %v3770_v55 = vpop.f32.mrb[127].mxu1 }
 0x1f1   :  { %v1926_v41 = vadd.f32 %v3768_v17, %v5152_v33  ;;  %v3771_v20 = vadd.f32 %v3770_v55, %v3769_v61  ;;  %3904 = vmatprep.mubr.bf16.mxu0 %v2006_v36 }
 0x1f3   :  { %v1929_v14 = vadd.f32 %v3771_v20, %v5156_v45  ;;  %v1986_v2 = vmax.f32 %v1926_v41, 0.0  ;;  %v4106_v45 = vld [vmem:[%s5704_s5 + $0x30] sm:$0xff]   ;;  %v4111_v41 = vld [vmem:[%s5706_s7 + $0x18] sm:$0xff]  }
 0x1f4   :  { %3928 = vmatprep.subr.bf16.mxu1 %v4106_v45 }
 0x1f5   :  { %v1987_v46 = vmax.f32 %v1929_v14, 0.0  ;;  %v3772_v22 = vpop.f32.mrb[128].mxu1  ;;  %3929 = vmatpush3.bf16.msra.mxu1 %v4106_v45 }
 0x1f6   :  { %v3773_v62 = vpop.f32.mrb[129].mxu1 }
 0x1f7   :  { %v3774_v37 = vadd.f32 %v3773_v62, %v3772_v22  ;;  %v3775_v19 = vpop.f32.mrb[130].mxu1  ;;  %v2007_v0 = vpack.c.bf16 %v1987_v46, %v1986_v2 }
 0x1f8   :  { %v3776_v59 = vpop.f32.mrb[131].mxu1 }
 0x1f9   :  { %v1934_v9 = vadd.f32 %v3774_v37, %v5160_v60  ;;  %v3777_v3 = vadd.f32 %v3776_v59, %v3775_v19  ;;  %3905 = vmatmul.mubr.bf16.gmra.mrb[132].mxu0 %v2007_v0  ;;  %v4112_v37 = vld [vmem:[%s5706_s7 + $0x20] sm:$0xff]   ;;  %v4113_v19 = vld [vmem:[%s5706_s7 + $0x28] sm:$0xff]  }
 0x1fb   :  { %v1937_v16 = vadd.f32 %v3777_v3, %v5164_v58  ;;  %v1988_v1 = vmax.f32 %v1934_v9, 0.0  ;;  %v4107_v58 = vld [vmem:[%s5704_s5 + $0x38] sm:$0xff]  }
 0x1fc   :  { %3930 = vmatprep.subr.bf16.mxu1 %v4107_v58 }
 0x1fd   :  { %v1989_v33 = vmax.f32 %v1937_v16, 0.0  ;;  %v3778_v47 = vpop.f32.mrb[132].mxu1  ;;  %3931 = vmatpush3.bf16.msra.mxu1 %v4107_v58 }
 0x1fe   :  { %v3779_v4 = vpop.f32.mrb[133].mxu1 }
 0x1ff   :  { %v3780_v28 = vadd.f32 %v3779_v4, %v3778_v47  ;;  %v3781_v42 = vpop.f32.mrb[134].mxu1  ;;  %v2008_v7 = vpack.c.bf16 %v1989_v33, %v1988_v1 }
 0x200   :  { %v3782_v23 = vpop.f32.mrb[135].mxu1 }
 0x201   :  { %v1942_v60 = vadd.f32 %v3780_v28, %v5168_v27  ;;  %v3783_v29 = vadd.f32 %v3782_v23, %v3781_v42  ;;  %3908 = vmatprep.mubr.bf16.mxu0 %v2008_v7 }
 0x203   :  { %v1945_v40 = vadd.f32 %v3783_v29, %v5172_v15  ;;  %v1990_v21 = vmax.f32 %v1942_v60, 0.0 }
 0x205   :  { %v1991_v8 = vmax.f32 %v1945_v40, 0.0  ;;  %v3784_v24 = vpop.f32.mrb[136].mxu1 }
 0x206   :  { %v3785_v51 = vpop.f32.mrb[137].mxu1 }
 0x207   :  { %v3786_v11 = vadd.f32 %v3785_v51, %v3784_v24  ;;  %v3787_v34 = vpop.f32.mrb[138].mxu1  ;;  %v2009_v25 = vpack.c.bf16 %v1991_v8, %v1990_v21 }
 0x208   :  { %v3788_v49 = vpop.f32.mrb[139].mxu1 }
 0x209   :  { %v1950_v27 = vadd.f32 %v3786_v11, %v5176_v39  ;;  %v3789_v57 = vadd.f32 %v3788_v49, %v3787_v34  ;;  %3909 = vmatmul.mubr.bf16.gmra.mrb[136].mxu0 %v2009_v25 }
 0x20b   :  { %v1953_v5 = vadd.f32 %v3789_v57, %v5180_v30  ;;  %v1992_v12 = vmax.f32 %v1950_v27, 0.0  ;;  %v4108_v30 = vld [vmem:[%s5706_s7] sm:$0xff]  }
 0x20c   :  { %3964 = vmatprep.subr.bf16.mxu0 %v4108_v30 }
 0x20d   :  { %v1993_v63 = vmax.f32 %v1953_v5, 0.0  ;;  %v3790_v50 = vpop.f32.mrb[140].mxu1  ;;  %3965 = vmatpush3.bf16.msra.mxu0 %v4108_v30 }
 0x20e   :  { %v3791_v15 = vpop.f32.mrb[141].mxu1  ;;  %3966 = vmatprep.subr.bf16.mxu0 %v4109_v43 }
 0x20f   :  { %v3792_v44 = vadd.f32 %v3791_v15, %v3790_v50  ;;  %v3793_v38 = vpop.f32.mrb[142].mxu1  ;;  %v2010_v32 = vpack.c.bf16 %v1993_v63, %v1992_v12 }
 0x210   :  { %v3794_v52 = vpop.f32.mrb[143].mxu1 }
 0x211   :  { %v1958_v10 = vadd.f32 %v3792_v44, %v5184_v6  ;;  %v3795_v35 = vadd.f32 %v3794_v52, %v3793_v38  ;;  %3912 = vmatprep.mubr.bf16.mxu0 %v2010_v32  ;;  %v5222_v6 = vld [vmem:[%s5705_s4] ss:$0 sm:$0xff]  ;;  %3967 = vmatpush3.bf16.msra.mxu0 %v4109_v43 }
 0x212   :  { %3968 = vmatprep.subr.bf16.mxu0 %v4110_v54 }
 0x213   :  { %v1961_v48 = vadd.f32 %v3795_v35, %v5188_v18  ;;  %v1994_v53 = vmax.f32 %v1958_v10, 0.0 }
 0x215   :  { %v1995_v39 = vmax.f32 %v1961_v48, 0.0  ;;  %3969 = vmatpush3.bf16.msra.mxu0 %v4110_v54 }
 0x216   :  { %3970 = vmatprep.subr.bf16.mxu0 %v4111_v41 }
 0x217   :  { %v2011_v56 = vpack.c.bf16 %v1995_v39, %v1994_v53 }
 0x219   :  { %3913 = vmatmul.mubr.bf16.gmra.mrb[140].mxu0 %v2011_v56 }
 0x21a   :  { %3971 = vmatpush3.bf16.msra.mxu0 %v4111_v41 }
 0x21b   :  { %3972 = vmatprep.subr.bf16.mxu0 %v4112_v37 }
 0x21e   :  { %3973 = vmatpush3.bf16.msra.mxu0 %v4112_v37 }
 0x21f   :  { %3974 = vmatprep.subr.bf16.mxu0 %v4113_v19 }
 0x222   :  { %3975 = vmatpush3.bf16.msra.mxu0 %v4113_v19 }
 0x27c   :  { %v3886_v18 = vpop.f32.mrb[112].mxu0 }
 0x27d   :  { %v2126_v26 = vadd.f32 %v3886_v18, %v5222_v6  ;;  %v2117_v31 = vpop.f32.mrb[113].mxu0 }
 0x27e   :  { %v2118_v13 = vadd.f32 %v5222_v6, %v2117_v31  ;;  %v3887_v17 = vpop.f32.mrb[114].mxu0 }
 0x27f   :  { %v2129_v61 = vadd.f32 %v3887_v17, %v5222_v6  ;;  %v2120_v36 = vpop.f32.mrb[115].mxu0  ;;  %v2246_v20 = vmax.f32 %v2126_v26, 0.0 }
 0x280   :  { %v2121_v55 = vadd.f32 %v5222_v6, %v2120_v36  ;;  %v2244_v2 = vmax.f32 %v2118_v13, 0.0 }
 0x281   :  { %v2247_v14 = vmax.f32 %v2129_v61, 0.0 }
 0x282   :  { %v2245_v46 = vmax.f32 %v2121_v55, 0.0 }
 0x283   :  { %v2277_v22 = vpack.c.bf16 %v2247_v14, %v2246_v20 }
 0x284   :  { %v2276_v62 = vpack.c.bf16 %v2245_v46, %v2244_v2 }
 0x286   :  { %3932 = vmatprep.mubr.bf16.mxu1 %v2276_v62 }
 0x287   :  { %3933 = vmatmul.mubr.bf16.vlgmr.msra.gmra.mrb[144].mxu1 %v2277_v22 }
 0x28c   :  { %v3890_v0 = vpop.f32.mrb[116].mxu0 }
 0x28d   :  { %v2142_v59 = vadd.f32 %v3890_v0, %v5222_v6  ;;  %v2133_v9 = vpop.f32.mrb[117].mxu0 }
 0x28e   :  { %v2134_v3 = vadd.f32 %v5222_v6, %v2133_v9  ;;  %v3891_v16 = vpop.f32.mrb[118].mxu0 }
 0x28f   :  { %v2145_v1 = vadd.f32 %v3891_v16, %v5222_v6  ;;  %v2136_v33 = vpop.f32.mrb[119].mxu0  ;;  %v2250_v45 = vmax.f32 %v2142_v59, 0.0 }
 0x290   :  { %v2137_v47 = vadd.f32 %v5222_v6, %v2136_v33  ;;  %v2248_v28 = vmax.f32 %v2134_v3, 0.0 }
 0x291   :  { %v2251_v4 = vmax.f32 %v2145_v1, 0.0 }
 0x292   :  { %v2249_v42 = vmax.f32 %v2137_v47, 0.0  ;;  %v4114_v47 = vld [vmem:[%s5706_s7 + $0x30] sm:$0xff]  }
 0x293   :  { %v2279_v7 = vpack.c.bf16 %v2251_v4, %v2250_v45  ;;  %3976 = vmatprep.subr.bf16.mxu0 %v4114_v47 }
 0x294   :  { %v2278_v23 = vpack.c.bf16 %v2249_v42, %v2248_v28  ;;  %3977 = vmatpush3.bf16.msra.mxu0 %v4114_v47 }
 0x296   :  { %3936 = vmatprep.mubr.bf16.mxu1 %v2278_v23 }
 0x297   :  { %3937 = vmatmul.mubr.bf16.gmra.mrb[148].mxu1 %v2279_v7 }
 0x29c   :  { %v3894_v60 = vpop.f32.mrb[120].mxu0 }
 0x29d   :  { %v2158_v29 = vadd.f32 %v3894_v60, %v5222_v6  ;;  %v2149_v58 = vpop.f32.mrb[121].mxu0 }
 0x29e   :  { %v2150_v40 = vadd.f32 %v5222_v6, %v2149_v58  ;;  %v3895_v21 = vpop.f32.mrb[122].mxu0 }
 0x29f   :  { %v2161_v8 = vadd.f32 %v3895_v21, %v5222_v6  ;;  %v2152_v24 = vpop.f32.mrb[123].mxu0  ;;  %v2254_v11 = vmax.f32 %v2158_v29, 0.0  ;;  %v4115_v29 = vld [vmem:[%s5706_s7 + $0x38] sm:$0xff]  }
 0x2a0   :  { %v2153_v51 = vadd.f32 %v5222_v6, %v2152_v24  ;;  %v2252_v25 = vmax.f32 %v2150_v40, 0.0  ;;  %3978 = vmatprep.subr.bf16.mxu0 %v4115_v29 }
 0x2a1   :  { %v2255_v34 = vmax.f32 %v2161_v8, 0.0  ;;  %3979 = vmatpush3.bf16.msra.mxu0 %v4115_v29 }
 0x2a2   :  { %v2253_v49 = vmax.f32 %v2153_v51, 0.0 }
 0x2a3   :  { %v2281_v27 = vpack.c.bf16 %v2255_v34, %v2254_v11 }
 0x2a4   :  { %v2280_v57 = vpack.c.bf16 %v2253_v49, %v2252_v25 }
 0x2a6   :  { %3940 = vmatprep.mubr.bf16.mxu1 %v2280_v57 }
 0x2a7   :  { %3941 = vmatmul.mubr.bf16.gmra.mrb[152].mxu1 %v2281_v27 }
 0x2ac   :  { %v3898_v5 = vpop.f32.mrb[124].mxu0 }
 0x2ad   :  { %v2174_v12 = vadd.f32 %v3898_v5, %v5222_v6  ;;  %v2165_v63 = vpop.f32.mrb[125].mxu0 }
 0x2ae   :  { %v2166_v50 = vadd.f32 %v5222_v6, %v2165_v63  ;;  %v3899_v15 = vpop.f32.mrb[126].mxu0 }
 0x2af   :  { %v2177_v44 = vadd.f32 %v3899_v15, %v5222_v6  ;;  %v2168_v38 = vpop.f32.mrb[127].mxu0  ;;  %v2258_v52 = vmax.f32 %v2174_v12, 0.0 }
 0x2b0   :  { %v2169_v32 = vadd.f32 %v5222_v6, %v2168_v38  ;;  %v2256_v35 = vmax.f32 %v2166_v50, 0.0 }
 0x2b1   :  { %v2259_v10 = vmax.f32 %v2177_v44, 0.0 }
 0x2b2   :  { %v2257_v48 = vmax.f32 %v2169_v32, 0.0 }
 0x2b3   :  { %v2283_v53 = vpack.c.bf16 %v2259_v10, %v2258_v52  ;;  %v5277_v10 = vld [vmem:[%s5707_s6] ss:$0 sm:$0xff] }
 0x2b4   :  { %v2282_v39 = vpack.c.bf16 %v2257_v48, %v2256_v35 }
 0x2b6   :  { %3944 = vmatprep.mubr.bf16.mxu1 %v2282_v39 }
 0x2b7   :  { %3945 = vmatmul.mubr.bf16.gmra.mrb[156].mxu1 %v2283_v53 }
 0x2bc   :  { %v3902_v56 = vpop.f32.mrb[128].mxu0 }
 0x2bd   :  { %v2190_v30 = vadd.f32 %v3902_v56, %v5222_v6  ;;  %v2181_v43 = vpop.f32.mrb[129].mxu0 }
 0x2be   :  { %v2182_v18 = vadd.f32 %v5222_v6, %v2181_v43  ;;  %v3903_v54 = vpop.f32.mrb[130].mxu0 }
 0x2bf   :  { %v2193_v26 = vadd.f32 %v3903_v54, %v5222_v6  ;;  %v2184_v31 = vpop.f32.mrb[131].mxu0  ;;  %v2262_v17 = vmax.f32 %v2190_v30, 0.0 }
 0x2c0   :  { %v2185_v13 = vadd.f32 %v5222_v6, %v2184_v31  ;;  %v2260_v36 = vmax.f32 %v2182_v18, 0.0 }
 0x2c1   :  { %v2263_v61 = vmax.f32 %v2193_v26, 0.0 }
 0x2c2   :  { %v2261_v55 = vmax.f32 %v2185_v13, 0.0 }
 0x2c3   :  { %v2285_v41 = vpack.c.bf16 %v2263_v61, %v2262_v17 }
 0x2c4   :  { %v2284_v20 = vpack.c.bf16 %v2261_v55, %v2260_v36 }
 0x2c6   :  { %3948 = vmatprep.mubr.bf16.mxu1 %v2284_v20 }
 0x2c7   :  { %3949 = vmatmul.mubr.bf16.gmra.mrb[160].mxu1 %v2285_v41 }
 0x2cc   :  { %v3906_v14 = vpop.f32.mrb[132].mxu0 }
 0x2cd   :  { %v2206_v2 = vadd.f32 %v3906_v14, %v5222_v6  ;;  %v2197_v46 = vpop.f32.mrb[133].mxu0 }
 0x2ce   :  { %v2198_v22 = vadd.f32 %v5222_v6, %v2197_v46  ;;  %v3907_v62 = vpop.f32.mrb[134].mxu0 }
 0x2cf   :  { %v2209_v37 = vadd.f32 %v3907_v62, %v5222_v6  ;;  %v2200_v19 = vpop.f32.mrb[135].mxu0  ;;  %v2266_v59 = vmax.f32 %v2206_v2, 0.0 }
 0x2d0   :  { %v2201_v0 = vadd.f32 %v5222_v6, %v2200_v19  ;;  %v2264_v3 = vmax.f32 %v2198_v22, 0.0 }
 0x2d1   :  { %v2267_v9 = vmax.f32 %v2209_v37, 0.0 }
 0x2d2   :  { %v2265_v16 = vmax.f32 %v2201_v0, 0.0 }
 0x2d3   :  { %v2287_v1 = vpack.c.bf16 %v2267_v9, %v2266_v59 }
 0x2d4   :  { %v2286_v33 = vpack.c.bf16 %v2265_v16, %v2264_v3 }
 0x2d6   :  { %3952 = vmatprep.mubr.bf16.mxu1 %v2286_v33 }
 0x2d7   :  { %3953 = vmatmul.mubr.bf16.gmra.mrb[164].mxu1 %v2287_v1 }
 0x2dc   :  { %v3910_v45 = vpop.f32.mrb[136].mxu0 }
 0x2dd   :  { %v2222_v4 = vadd.f32 %v3910_v45, %v5222_v6  ;;  %v2213_v28 = vpop.f32.mrb[137].mxu0 }
 0x2de   :  { %v2214_v42 = vadd.f32 %v5222_v6, %v2213_v28  ;;  %v3911_v7 = vpop.f32.mrb[138].mxu0 }
 0x2df   :  { %v2225_v23 = vadd.f32 %v3911_v7, %v5222_v6  ;;  %v2216_v60 = vpop.f32.mrb[139].mxu0  ;;  %v2270_v40 = vmax.f32 %v2222_v4, 0.0 }
 0x2e0   :  { %v2217_v58 = vadd.f32 %v5222_v6, %v2216_v60  ;;  %v2268_v8 = vmax.f32 %v2214_v42, 0.0 }
 0x2e1   :  { %v2271_v21 = vmax.f32 %v2225_v23, 0.0 }
 0x2e2   :  { %v2269_v24 = vmax.f32 %v2217_v58, 0.0 }
 0x2e3   :  { %v2289_v51 = vpack.c.bf16 %v2271_v21, %v2270_v40 }
 0x2e4   :  { %v2288_v11 = vpack.c.bf16 %v2269_v24, %v2268_v8 }
 0x2e6   :  { %3956 = vmatprep.mubr.bf16.mxu1 %v2288_v11 }
 0x2e7   :  { %3957 = vmatmul.mubr.bf16.gmra.mrb[168].mxu1 %v2289_v51 }
 0x2ec   :  { %v3914_v34 = vpop.f32.mrb[140].mxu0 }
 0x2ed   :  { %v2238_v25 = vadd.f32 %v3914_v34, %v5222_v6  ;;  %v2229_v49 = vpop.f32.mrb[141].mxu0 }
 0x2ee   :  { %v2230_v27 = vadd.f32 %v5222_v6, %v2229_v49  ;;  %v3915_v57 = vpop.f32.mrb[142].mxu0 }
 0x2ef   :  { %v2241_v5 = vadd.f32 %v3915_v57, %v5222_v6  ;;  %v2232_v12 = vpop.f32.mrb[143].mxu0  ;;  %v2274_v50 = vmax.f32 %v2238_v25, 0.0 }
 0x2f0   :  { %v2233_v63 = vadd.f32 %v5222_v6, %v2232_v12  ;;  %v2272_v44 = vmax.f32 %v2230_v27, 0.0 }
 0x2f1   :  { %v2275_v15 = vmax.f32 %v2241_v5, 0.0 }
 0x2f2   :  { %v2273_v38 = vmax.f32 %v2233_v63, 0.0 }
 0x2f3   :  { %v2291_v32 = vpack.c.bf16 %v2275_v15, %v2274_v50 }
 0x2f4   :  { %v2290_v52 = vpack.c.bf16 %v2273_v38, %v2272_v44 }
 0x2f6   :  { %3960 = vmatprep.mubr.bf16.mxu1 %v2290_v52 }
 0x2f7   :  { %3961 = vmatmul.mubr.bf16.gmra.mrb[172].mxu1 %v2291_v32 }
 0x35a   :  { %v3934_v35 = vpop.f32.mrb[144].mxu1 }
 0x35b   :  { %v2406_v48 = vadd.f32 %v3934_v35, %v5277_v10  ;;  %v2397_v53 = vpop.f32.mrb[145].mxu1 }
 0x35c   :  { %v2398_v39 = vadd.f32 %v5277_v10, %v2397_v53  ;;  %v3935_v6 = vpop.f32.mrb[146].mxu1 }
 0x35d   :  { %v2409_v56 = vadd.f32 %v3935_v6, %v5277_v10  ;;  %v2400_v30 = vpop.f32.mrb[147].mxu1  ;;  %v2526_v18 = vmax.f32 %v2406_v48, 0.0 }
 0x35e   :  { %v2401_v43 = vadd.f32 %v5277_v10, %v2400_v30  ;;  %v2524_v26 = vmax.f32 %v2398_v39, 0.0 }
 0x35f   :  { %v2527_v54 = vmax.f32 %v2409_v56, 0.0 }
 0x360   :  { %v2525_v31 = vmax.f32 %v2401_v43, 0.0 }
 0x361   :  { %v2557_v13 = vpack.c.bf16 %v2527_v54, %v2526_v18 }
 0x362   :  { %v2556_v17 = vpack.c.bf16 %v2525_v31, %v2524_v26 }
 0x364   :  { %3980 = vmatprep.mubr.bf16.mxu0 %v2556_v17 }
 0x365   :  { %3981 = vmatmul.mubr.bf16.vlgmr.msra.gmra.mrb[144].mxu0 %v2557_v13 }
 0x36a   :  { %v3938_v61 = vpop.f32.mrb[148].mxu1 }
 0x36b   :  { %v2422_v36 = vadd.f32 %v3938_v61, %v5277_v10  ;;  %v2413_v55 = vpop.f32.mrb[149].mxu1 }
 0x36c   :  { %v2414_v41 = vadd.f32 %v5277_v10, %v2413_v55  ;;  %v3939_v20 = vpop.f32.mrb[150].mxu1 }
 0x36d   :  { %v2425_v14 = vadd.f32 %v3939_v20, %v5277_v10  ;;  %v2416_v2 = vpop.f32.mrb[151].mxu1  ;;  %v2530_v22 = vmax.f32 %v2422_v36, 0.0 }
 0x36e   :  { %v2417_v46 = vadd.f32 %v5277_v10, %v2416_v2  ;;  %v2528_v37 = vmax.f32 %v2414_v41, 0.0 }
 0x36f   :  { %v2531_v62 = vmax.f32 %v2425_v14, 0.0 }
 0x370   :  { %v2529_v19 = vmax.f32 %v2417_v46, 0.0 }
 0x371   :  { %v2559_v0 = vpack.c.bf16 %v2531_v62, %v2530_v22 }
 0x372   :  { %v2558_v59 = vpack.c.bf16 %v2529_v19, %v2528_v37 }
 0x374   :  { %3984 = vmatprep.mubr.bf16.mxu0 %v2558_v59 }
 0x375   :  { %3985 = vmatmul.mubr.bf16.gmra.mrb[148].mxu0 %v2559_v0 }
 0x37a   :  { %v3942_v9 = vpop.f32.mrb[152].mxu1 }
 0x37b   :  { %v2438_v3 = vadd.f32 %v3942_v9, %v5277_v10  ;;  %v2429_v16 = vpop.f32.mrb[153].mxu1 }
 0x37c   :  { %v2430_v1 = vadd.f32 %v5277_v10, %v2429_v16  ;;  %v3943_v33 = vpop.f32.mrb[154].mxu1 }
 0x37d   :  { %v2441_v47 = vadd.f32 %v3943_v33, %v5277_v10  ;;  %v2432_v45 = vpop.f32.mrb[155].mxu1  ;;  %v2534_v28 = vmax.f32 %v2438_v3, 0.0 }
 0x37e   :  { %v2433_v4 = vadd.f32 %v5277_v10, %v2432_v45  ;;  %v2532_v7 = vmax.f32 %v2430_v1, 0.0 }
 0x37f   :  { %v2535_v42 = vmax.f32 %v2441_v47, 0.0 }
 0x380   :  { %v2533_v23 = vmax.f32 %v2433_v4, 0.0 }
 0x381   :  { %v2561_v60 = vpack.c.bf16 %v2535_v42, %v2534_v28 }
 0x382   :  { %v2560_v29 = vpack.c.bf16 %v2533_v23, %v2532_v7 }
 0x384   :  { %3988 = vmatprep.mubr.bf16.mxu0 %v2560_v29 }
 0x385   :  { %3989 = vmatmul.mubr.bf16.gmra.mrb[152].mxu0 %v2561_v60 }
 0x38a   :  { %v3946_v58 = vpop.f32.mrb[156].mxu1 }
 0x38b   :  { %v2454_v40 = vadd.f32 %v3946_v58, %v5277_v10  ;;  %v2445_v21 = vpop.f32.mrb[157].mxu1 }
 0x38c   :  { %v2446_v8 = vadd.f32 %v5277_v10, %v2445_v21  ;;  %v3947_v24 = vpop.f32.mrb[158].mxu1 }
 0x38d   :  { %v2457_v51 = vadd.f32 %v3947_v24, %v5277_v10  ;;  %v2448_v11 = vpop.f32.mrb[159].mxu1  ;;  %v2538_v25 = vmax.f32 %v2454_v40, 0.0 }
 0x38e   :  { %v2449_v34 = vadd.f32 %v5277_v10, %v2448_v11  ;;  %v2536_v27 = vmax.f32 %v2446_v8, 0.0 }
 0x38f   :  { %v2539_v49 = vmax.f32 %v2457_v51, 0.0 }
 0x390   :  { %v2537_v57 = vmax.f32 %v2449_v34, 0.0  ;;  %v5314_v34 = vld [vmem:[%s5708_s8] ss:$0 sm:$0xff] }
 0x391   :  { %v2563_v5 = vpack.c.bf16 %v2539_v49, %v2538_v25 }
 0x392   :  { %v2562_v12 = vpack.c.bf16 %v2537_v57, %v2536_v27 }
 0x394   :  { %3992 = vmatprep.mubr.bf16.mxu0 %v2562_v12 }
 0x395   :  { %3993 = vmatmul.mubr.bf16.gmra.mrb[156].mxu0 %v2563_v5 }
 0x39a   :  { %v3950_v63 = vpop.f32.mrb[160].mxu1 }
 0x39b   :  { %v2470_v50 = vadd.f32 %v3950_v63, %v5277_v10  ;;  %v2461_v15 = vpop.f32.mrb[161].mxu1 }
 0x39c   :  { %v2462_v44 = vadd.f32 %v5277_v10, %v2461_v15  ;;  %v3951_v38 = vpop.f32.mrb[162].mxu1 }
 0x39d   :  { %v2473_v32 = vadd.f32 %v3951_v38, %v5277_v10  ;;  %v2464_v52 = vpop.f32.mrb[163].mxu1  ;;  %v2542_v48 = vmax.f32 %v2470_v50, 0.0 }
 0x39e   :  { %v2465_v35 = vadd.f32 %v5277_v10, %v2464_v52  ;;  %v2540_v39 = vmax.f32 %v2462_v44, 0.0 }
 0x39f   :  { %v2543_v53 = vmax.f32 %v2473_v32, 0.0 }
 0x3a0   :  { %v2541_v6 = vmax.f32 %v2465_v35, 0.0 }
 0x3a1   :  { %v2565_v56 = vpack.c.bf16 %v2543_v53, %v2542_v48 }
 0x3a2   :  { %v2564_v30 = vpack.c.bf16 %v2541_v6, %v2540_v39 }
 0x3a4   :  { %3996 = vmatprep.mubr.bf16.mxu0 %v2564_v30 }
 0x3a5   :  { %3997 = vmatmul.mubr.bf16.gmra.mrb[160].mxu0 %v2565_v56 }
 0x3aa   :  { %v3954_v43 = vpop.f32.mrb[164].mxu1 }
 0x3ab   :  { %v2486_v18 = vadd.f32 %v3954_v43, %v5277_v10  ;;  %v2477_v54 = vpop.f32.mrb[165].mxu1 }
 0x3ac   :  { %v2478_v26 = vadd.f32 %v5277_v10, %v2477_v54  ;;  %v3955_v31 = vpop.f32.mrb[166].mxu1 }
 0x3ad   :  { %v2489_v13 = vadd.f32 %v3955_v31, %v5277_v10  ;;  %v2480_v17 = vpop.f32.mrb[167].mxu1  ;;  %v2546_v36 = vmax.f32 %v2486_v18, 0.0 }
 0x3ae   :  { %v2481_v61 = vadd.f32 %v5277_v10, %v2480_v17  ;;  %v2544_v41 = vmax.f32 %v2478_v26, 0.0 }
 0x3af   :  { %v2547_v55 = vmax.f32 %v2489_v13, 0.0 }
 0x3b0   :  { %v2545_v20 = vmax.f32 %v2481_v61, 0.0 }
 0x3b1   :  { %v2567_v14 = vpack.c.bf16 %v2547_v55, %v2546_v36 }
 0x3b2   :  { %v2566_v2 = vpack.c.bf16 %v2545_v20, %v2544_v41 }
 0x3b4   :  { %4000 = vmatprep.mubr.bf16.mxu0 %v2566_v2 }
 0x3b5   :  { %4001 = vmatmul.mubr.bf16.gmra.mrb[164].mxu0 %v2567_v14 }
 0x3ba   :  { %v3958_v46 = vpop.f32.mrb[168].mxu1 }
 0x3bb   :  { %v2502_v22 = vadd.f32 %v3958_v46, %v5277_v10  ;;  %v2493_v62 = vpop.f32.mrb[169].mxu1 }
 0x3bc   :  { %v2494_v37 = vadd.f32 %v5277_v10, %v2493_v62  ;;  %v3959_v19 = vpop.f32.mrb[170].mxu1 }
 0x3bd   :  { %v2505_v0 = vadd.f32 %v3959_v19, %v5277_v10  ;;  %v2496_v59 = vpop.f32.mrb[171].mxu1  ;;  %v2550_v3 = vmax.f32 %v2502_v22, 0.0 }
 0x3be   :  { %v2497_v9 = vadd.f32 %v5277_v10, %v2496_v59  ;;  %v2548_v1 = vmax.f32 %v2494_v37, 0.0 }
 0x3bf   :  { %v2551_v16 = vmax.f32 %v2505_v0, 0.0 }
 0x3c0   :  { %v2549_v33 = vmax.f32 %v2497_v9, 0.0 }
 0x3c1   :  { %v2569_v47 = vpack.c.bf16 %v2551_v16, %v2550_v3 }
 0x3c2   :  { %v2568_v45 = vpack.c.bf16 %v2549_v33, %v2548_v1 }
 0x3c4   :  { %4004 = vmatprep.mubr.bf16.mxu0 %v2568_v45 }
 0x3c5   :  { %4005 = vmatmul.mubr.bf16.gmra.mrb[168].mxu0 %v2569_v47 }
 0x3ca   :  { %v3962_v4 = vpop.f32.mrb[172].mxu1 }
 0x3cb   :  { %v2518_v28 = vadd.f32 %v3962_v4, %v5277_v10  ;;  %v2509_v42 = vpop.f32.mrb[173].mxu1 }
 0x3cc   :  { %v2510_v7 = vadd.f32 %v5277_v10, %v2509_v42  ;;  %v3963_v23 = vpop.f32.mrb[174].mxu1 }
 0x3cd   :  { %v2521_v60 = vadd.f32 %v3963_v23, %v5277_v10  ;;  %v2512_v29 = vpop.f32.mrb[175].mxu1  ;;  %v2554_v40 = vmax.f32 %v2518_v28, 0.0 }
 0x3ce   :  { %v2513_v58 = vadd.f32 %v5277_v10, %v2512_v29  ;;  %v2552_v8 = vmax.f32 %v2510_v7, 0.0 }
 0x3cf   :  { %v2555_v21 = vmax.f32 %v2521_v60, 0.0 }
 0x3d0   :  { %v2553_v24 = vmax.f32 %v2513_v58, 0.0 }
 0x3d1   :  { %v2571_v51 = vpack.c.bf16 %v2555_v21, %v2554_v40 }
 0x3d2   :  { %v2570_v11 = vpack.c.bf16 %v2553_v24, %v2552_v8 }
 0x3d4   :  { %4008 = vmatprep.mubr.bf16.mxu0 %v2570_v11 }
 0x3d5   :  { %4009 = vmatmul.mubr.bf16.gmra.mrb[172].mxu0 %v2571_v51 }
 0x438   :  { %v3982_v25 = vpop.f32.mrb[144].mxu0 }
 0x439   :  { %v5317_v49 = vadd.f32 %v3982_v25, %v5314_v34  ;;  %v2677_v27 = vpop.f32.mrb[145].mxu0 }
 0x43a   :  { %v5320_v10 = vadd.f32 %v5314_v34, %v2677_v27  ;;  %v3983_v57 = vpop.f32.mrb[146].mxu0 }
 0x43b   :  { %2808 = vmax.xlane.f32.xlu1 %v5317_v49  ;;  %v2680_v5 = vpop.f32.mrb[147].mxu0  ;;  %v5325_v12 = vadd.f32 %v3983_v57, %v5314_v34 }
 0x43c   :  { %2804 = vmax.xlane.f32.xlu0 %v5320_v10  ;;  %v5328_v63 = vadd.f32 %v5314_v34, %v2680_v5 }
 0x43f   :  { %2810 = vmax.xlane.f32.xlu1 %v5325_v12 }
 0x440   :  { %2806 = vmax.xlane.f32.xlu0 %v5328_v63 }
 0x448   :  { %v3986_v50 = vpop.f32.mrb[148].mxu0 }
 0x449   :  { %v5333_v15 = vadd.f32 %v3986_v50, %v5314_v34  ;;  %v2693_v44 = vpop.f32.mrb[149].mxu0 }
 0x44a   :  { %v3987_v38 = vpop.f32.mrb[150].mxu0  ;;  %v5340_v35 = vadd.f32 %v5314_v34, %v2693_v44 }
 0x44b   :  { %v5336_v32 = vadd.f32 %v3987_v38, %v5314_v34  ;;  %v2696_v52 = vpop.f32.mrb[151].mxu0  ;;  %2816 = vmax.xlane.f32.xlu0 %v5333_v15 }
 0x44c   :  { %v5344_v48 = vadd.f32 %v5314_v34, %v2696_v52 }
 0x44d   :  { %2818 = vmax.xlane.f32.xlu1 %v5336_v32 }
 0x44f   :  { %2812 = vmax.xlane.f32.xlu0 %v5340_v35 }
 0x451   :  { %2814 = vmax.xlane.f32.xlu1 %v5344_v48 }
 0x458   :  { %v3990_v53 = vpop.f32.mrb[152].mxu0 }
 0x459   :  { %v5349_v39 = vadd.f32 %v3990_v53, %v5314_v34  ;;  %v2709_v6 = vpop.f32.mrb[153].mxu0 }
 0x45a   :  { %v3991_v56 = vpop.f32.mrb[154].mxu0  ;;  %v5356_v18 = vadd.f32 %v5314_v34, %v2709_v6 }
 0x45b   :  { %v5352_v30 = vadd.f32 %v3991_v56, %v5314_v34  ;;  %v2712_v43 = vpop.f32.mrb[155].mxu0  ;;  %2824 = vmax.xlane.f32.xlu0 %v5349_v39 }
 0x45c   :  { %v5360_v54 = vadd.f32 %v5314_v34, %v2712_v43 }
 0x45d   :  { %2826 = vmax.xlane.f32.xlu1 %v5352_v30 }
 0x45f   :  { %2820 = vmax.xlane.f32.xlu0 %v5356_v18 }
 0x461   :  { %2822 = vmax.xlane.f32.xlu1 %v5360_v54 }
 0x468   :  { %v3994_v26 = vpop.f32.mrb[156].mxu0 }
 0x469   :  { %v5365_v31 = vadd.f32 %v3994_v26, %v5314_v34  ;;  %v2725_v13 = vpop.f32.mrb[157].mxu0 }
 0x46a   :  { %v3995_v17 = vpop.f32.mrb[158].mxu0  ;;  %v5372_v55 = vadd.f32 %v5314_v34, %v2725_v13 }
 0x46b   :  { %v5368_v61 = vadd.f32 %v3995_v17, %v5314_v34  ;;  %v2728_v36 = vpop.f32.mrb[159].mxu0  ;;  %2832 = vmax.xlane.f32.xlu0 %v5365_v31 }
 0x46c   :  { %v5376_v41 = vadd.f32 %v5314_v34, %v2728_v36 }
 0x46d   :  { %2834 = vmax.xlane.f32.xlu1 %v5368_v61 }
 0x46f   :  { %2828 = vmax.xlane.f32.xlu0 %v5372_v55 }
 0x471   :  { %2830 = vmax.xlane.f32.xlu1 %v5376_v41 }
 0x478   :  { %v3998_v20 = vpop.f32.mrb[160].mxu0 }
 0x479   :  { %v5381_v14 = vadd.f32 %v3998_v20, %v5314_v34  ;;  %v2741_v2 = vpop.f32.mrb[161].mxu0 }
 0x47a   :  { %v3999_v46 = vpop.f32.mrb[162].mxu0  ;;  %v5388_v37 = vadd.f32 %v5314_v34, %v2741_v2 }
 0x47b   :  { %v5384_v22 = vadd.f32 %v3999_v46, %v5314_v34  ;;  %v2744_v62 = vpop.f32.mrb[163].mxu0  ;;  %2840 = vmax.xlane.f32.xlu0 %v5381_v14 }
 0x47c   :  { %v5392_v19 = vadd.f32 %v5314_v34, %v2744_v62 }
 0x47d   :  { %2842 = vmax.xlane.f32.xlu1 %v5384_v22 }
 0x47f   :  { %2836 = vmax.xlane.f32.xlu0 %v5388_v37 }
 0x481   :  { %2838 = vmax.xlane.f32.xlu1 %v5392_v19 }
 0x488   :  { %v4002_v0 = vpop.f32.mrb[164].mxu0 }
 0x489   :  { %v5397_v59 = vadd.f32 %v4002_v0, %v5314_v34  ;;  %v2757_v9 = vpop.f32.mrb[165].mxu0 }
 0x48a   :  { %v4003_v3 = vpop.f32.mrb[166].mxu0  ;;  %v5404_v33 = vadd.f32 %v5314_v34, %v2757_v9 }
 0x48b   :  { %v5400_v16 = vadd.f32 %v4003_v3, %v5314_v34  ;;  %v2760_v1 = vpop.f32.mrb[167].mxu0  ;;  %2848 = vmax.xlane.f32.xlu0 %v5397_v59 }
 0x48c   :  { %v5408_v47 = vadd.f32 %v5314_v34, %v2760_v1 }
 0x48d   :  { %2850 = vmax.xlane.f32.xlu1 %v5400_v16 }
 0x48f   :  { %2844 = vmax.xlane.f32.xlu0 %v5404_v33 }
 0x491   :  { %2846 = vmax.xlane.f32.xlu1 %v5408_v47 }
 0x498   :  { %v4006_v45 = vpop.f32.mrb[168].mxu0 }
 0x499   :  { %v5413_v4 = vadd.f32 %v4006_v45, %v5314_v34  ;;  %v2773_v28 = vpop.f32.mrb[169].mxu0 }
 0x49a   :  { %v4007_v42 = vpop.f32.mrb[170].mxu0  ;;  %v5420_v60 = vadd.f32 %v5314_v34, %v2773_v28 }
 0x49b   :  { %v5416_v7 = vadd.f32 %v4007_v42, %v5314_v34  ;;  %v2776_v23 = vpop.f32.mrb[171].mxu0  ;;  %2856 = vmax.xlane.f32.xlu0 %v5413_v4 }
 0x49c   :  { %v5424_v29 = vadd.f32 %v5314_v34, %v2776_v23 }
 0x49d   :  { %2858 = vmax.xlane.f32.xlu1 %v5416_v7 }
 0x49f   :  { %2852 = vmax.xlane.f32.xlu0 %v5420_v60 }
 0x4a1   :  { %2854 = vmax.xlane.f32.xlu1 %v5424_v29 }
 0x4a8   :  { %v4010_v58 = vpop.f32.mrb[172].mxu0 }
 0x4a9   :  { %v2789_v40 = vpop.f32.mrb[173].mxu0  ;;  %v5436_v11 = vadd.f32 %v4010_v58, %v5314_v34 }
 0x4aa   :  { %v5429_v21 = vadd.f32 %v5314_v34, %v2789_v40  ;;  %v4011_v8 = vpop.f32.mrb[174].mxu0 }
 0x4ab   :  { %v2792_v24 = vpop.f32.mrb[175].mxu0  ;;  %v5440_v25 = vadd.f32 %v4011_v8, %v5314_v34 }
 0x4ac   :  { %v5432_v51 = vadd.f32 %v5314_v34, %v2792_v24  ;;  %2860 = vmax.xlane.f32.xlu0 %v5429_v21 }
 0x4ae   :  { %2862 = vmax.xlane.f32.xlu1 %v5432_v51 }
 0x4b0   :  { %2864 = vmax.xlane.f32.xlu0 %v5436_v11 }
 0x4b2   :  { %2866 = vmax.xlane.f32.xlu1 %v5440_v25 }
 0x4c8   :  { %v2809_v27 = vpop.xlane.xlu1 %2808 }
 0x4c9   :  { %v2870_v57 = vsub.f32 %v5317_v49, %v2809_v27  ;;  %v2805_v5 = vpop.xlane.xlu0 %2804 }
 0x4ca   :  { %v2868_v50 = vsub.f32 %v5320_v10, %v2805_v5 }
 0x4cb   :  { %v2904_v44 = vmul.f32 1.442695, %v2870_v57 }
 0x4cc   :  { %v2900_v38 = vmul.f32 1.442695, %v2868_v50  ;;  %v2811_v52 = vpop.xlane.xlu1 %2810 }
 0x4cd   :  { %4116 = vpow2.f32 %v2904_v44  ;;  %v2871_v53 = vsub.f32 %v5325_v12, %v2811_v52  ;;  %v2807_v6 = vpop.xlane.xlu0 %2806 }
 0x4ce   :  { %v2869_v34 = vsub.f32 %v5328_v63, %v2807_v6  ;;  %4118 = vpow2.f32 %v2900_v38 }
 0x4cf   :  { %v2906_v56 = vmul.f32 1.442695, %v2871_v53 }
 0x4d0   :  { %v2902_v43 = vmul.f32 1.442695, %v2869_v34 }
 0x4d1   :  { %4120 = vpow2.f32 %v2906_v56 }
 0x4d2   :  { %4122 = vpow2.f32 %v2902_v43 }
 0x4d7   :  { %v5448_v26 = vpop.eup %4116 }
 0x4d8   :  { %2968 = vadd.xlane.f32.xlu0 %v5448_v26  ;;  %v2817_v49 = vpop.xlane.xlu0 %2816  ;;  %v5452_v13 = vpop.eup %4118 }
 0x4d9   :  { %v2874_v10 = vsub.f32 %v5333_v15, %v2817_v49 }
 0x4da   :  { %v2819_v17 = vpop.xlane.xlu1 %2818 }
 0x4db   :  { %v5454_v36 = vpop.eup %4120  ;;  %v2912_v12 = vmul.f32 1.442695, %v2874_v10  ;;  %v2875_v63 = vsub.f32 %v5336_v32, %v2819_v17 }
 0x4dc   :  { %2970 = vadd.xlane.f32.xlu1 %v5454_v36  ;;  %2964 = vadd.xlane.f32.xlu0 %v5452_v13  ;;  %v2813_v20 = vpop.xlane.xlu0 %2812  ;;  %v5460_v0 = vpop.eup %4122 }
 0x4dd   :  { %4124 = vpow2.f32 %v2912_v12  ;;  %v2914_v2 = vmul.f32 1.442695, %v2875_v63  ;;  %v2872_v46 = vsub.f32 %v5340_v35, %v2813_v20 }
 0x4de   :  { %v2815_v62 = vpop.xlane.xlu1 %2814 }
 0x4df   :  { %4126 = vpow2.f32 %v2914_v2  ;;  %v2908_v15 = vmul.f32 1.442695, %v2872_v46  ;;  %v2873_v9 = vsub.f32 %v5344_v48, %v2815_v62 }
 0x4e0   :  { %2966 = vadd.xlane.f32.xlu1 %v5460_v0 }
 0x4e1   :  { %4128 = vpow2.f32 %v2908_v15  ;;  %v2910_v32 = vmul.f32 1.442695, %v2873_v9 }
 0x4e3   :  { %4130 = vpow2.f32 %v2910_v32 }
 0x4e7   :  { %v5464_v3 = vpop.eup %4124 }
 0x4e8   :  { %2976 = vadd.xlane.f32.xlu0 %v5464_v3  ;;  %v2825_v1 = vpop.xlane.xlu0 %2824 }
 0x4e9   :  { %v5467_v45 = vpop.eup %4126  ;;  %v2878_v35 = vsub.f32 %v5349_v39, %v2825_v1 }
 0x4ea   :  { %v2827_v28 = vpop.xlane.xlu1 %2826  ;;  %2978 = vadd.xlane.f32.xlu1 %v5467_v45 }
 0x4eb   :  { %v5471_v42 = vpop.eup %4128  ;;  %v2920_v48 = vmul.f32 1.442695, %v2878_v35  ;;  %v2879_v23 = vsub.f32 %v5352_v30, %v2827_v28 }
 0x4ec   :  { %2972 = vadd.xlane.f32.xlu0 %v5471_v42  ;;  %v2821_v58 = vpop.xlane.xlu0 %2820 }
 0x4ed   :  { %v5475_v40 = vpop.eup %4130  ;;  %4132 = vpow2.f32 %v2920_v48  ;;  %v2922_v8 = vmul.f32 1.442695, %v2879_v23  ;;  %v2876_v24 = vsub.f32 %v5356_v18, %v2821_v58 }
 0x4ee   :  { %v2823_v27 = vpop.xlane.xlu1 %2822  ;;  %2974 = vadd.xlane.f32.xlu1 %v5475_v40 }
 0x4ef   :  { %4134 = vpow2.f32 %v2922_v8  ;;  %v2916_v39 = vmul.f32 1.442695, %v2876_v24  ;;  %v2877_v57 = vsub.f32 %v5360_v54, %v2823_v27 }
 0x4f1   :  { %4136 = vpow2.f32 %v2916_v39  ;;  %v2918_v5 = vmul.f32 1.442695, %v2877_v57 }
 0x4f3   :  { %4138 = vpow2.f32 %v2918_v5 }
 0x4f7   :  { %v5480_v30 = vpop.eup %4132 }
 0x4f8   :  { %2984 = vadd.xlane.f32.xlu0 %v5480_v30  ;;  %v2833_v50 = vpop.xlane.xlu0 %2832 }
 0x4f9   :  { %v5483_v44 = vpop.eup %4134  ;;  %v2882_v38 = vsub.f32 %v5365_v31, %v2833_v50 }
 0x4fa   :  { %v2835_v18 = vpop.xlane.xlu1 %2834  ;;  %2986 = vadd.xlane.f32.xlu1 %v5483_v44 }
 0x4fb   :  { %v5487_v52 = vpop.eup %4136  ;;  %v2928_v53 = vmul.f32 1.442695, %v2882_v38  ;;  %v2883_v54 = vsub.f32 %v5368_v61, %v2835_v18 }
 0x4fc   :  { %2980 = vadd.xlane.f32.xlu0 %v5487_v52  ;;  %v2829_v6 = vpop.xlane.xlu0 %2828 }
 0x4fd   :  { %v5491_v34 = vpop.eup %4138  ;;  %4140 = vpow2.f32 %v2928_v53  ;;  %v2930_v56 = vmul.f32 1.442695, %v2883_v54  ;;  %v2880_v43 = vsub.f32 %v5372_v55, %v2829_v6 }
 0x4fe   :  { %v2831_v49 = vpop.xlane.xlu1 %2830  ;;  %2982 = vadd.xlane.f32.xlu1 %v5491_v34 }
 0x4ff   :  { %4142 = vpow2.f32 %v2930_v56  ;;  %v2924_v31 = vmul.f32 1.442695, %v2880_v43  ;;  %v2881_v10 = vsub.f32 %v5376_v41, %v2831_v49 }
 0x501   :  { %4144 = vpow2.f32 %v2924_v31  ;;  %v2926_v17 = vmul.f32 1.442695, %v2881_v10 }
 0x503   :  { %4146 = vpow2.f32 %v2926_v17 }
 0x507   :  { %v5496_v61 = vpop.eup %4140 }
 0x508   :  { %2992 = vadd.xlane.f32.xlu0 %v5496_v61  ;;  %v2841_v12 = vpop.xlane.xlu0 %2840 }
 0x509   :  { %v5499_v63 = vpop.eup %4142  ;;  %v2886_v20 = vsub.f32 %v5381_v14, %v2841_v12 }
 0x50a   :  { %v2843_v55 = vpop.xlane.xlu1 %2842  ;;  %2994 = vadd.xlane.f32.xlu1 %v5499_v63 }
 0x50b   :  { %v5503_v2 = vpop.eup %4144  ;;  %v2936_v46 = vmul.f32 1.442695, %v2886_v20  ;;  %v2887_v41 = vsub.f32 %v5384_v22, %v2843_v55 }
 0x50c   :  { %2988 = vadd.xlane.f32.xlu0 %v5503_v2  ;;  %v2837_v62 = vpop.xlane.xlu0 %2836 }
 0x50d   :  { %v5507_v15 = vpop.eup %4146  ;;  %4148 = vpow2.f32 %v2936_v46  ;;  %v2938_v9 = vmul.f32 1.442695, %v2887_v41  ;;  %v2884_v32 = vsub.f32 %v5388_v37, %v2837_v62 }
 0x50e   :  { %v2839_v1 = vpop.xlane.xlu1 %2838  ;;  %2990 = vadd.xlane.f32.xlu1 %v5507_v15 }
 0x50f   :  { %4150 = vpow2.f32 %v2938_v9  ;;  %v2932_v14 = vmul.f32 1.442695, %v2884_v32  ;;  %v2885_v35 = vsub.f32 %v5392_v19, %v2839_v1 }
 0x511   :  { %4152 = vpow2.f32 %v2932_v14  ;;  %v2934_v28 = vmul.f32 1.442695, %v2885_v35 }
 0x513   :  { %4154 = vpow2.f32 %v2934_v28 }
 0x517   :  { %v5512_v22 = vpop.eup %4148 }
 0x518   :  { %3000 = vadd.xlane.f32.xlu0 %v5512_v22  ;;  %v2849_v48 = vpop.xlane.xlu0 %2848 }
 0x519   :  { %v5515_v23 = vpop.eup %4150  ;;  %v2890_v58 = vsub.f32 %v5397_v59, %v2849_v48 }
 0x51a   :  { %v2851_v37 = vpop.xlane.xlu1 %2850  ;;  %3002 = vadd.xlane.f32.xlu1 %v5515_v23 }
 0x51b   :  { %v5519_v8 = vpop.eup %4152  ;;  %v2944_v24 = vmul.f32 1.442695, %v2890_v58  ;;  %v2891_v19 = vsub.f32 %v5400_v16, %v2851_v37 }
 0x51c   :  { %2996 = vadd.xlane.f32.xlu0 %v5519_v8  ;;  %v2845_v27 = vpop.xlane.xlu0 %2844 }
 0x51d   :  { %v5523_v39 = vpop.eup %4154  ;;  %4156 = vpow2.f32 %v2944_v24  ;;  %v2946_v57 = vmul.f32 1.442695, %v2891_v19  ;;  %v2888_v5 = vsub.f32 %v5404_v33, %v2845_v27 }
 0x51e   :  { %v2847_v50 = vpop.xlane.xlu1 %2846  ;;  %2998 = vadd.xlane.f32.xlu1 %v5523_v39 }
 0x51f   :  { %4158 = vpow2.f32 %v2946_v57  ;;  %v2940_v59 = vmul.f32 1.442695, %v2888_v5  ;;  %v2889_v38 = vsub.f32 %v5408_v47, %v2847_v50 }
 0x521   :  { %4160 = vpow2.f32 %v2940_v59  ;;  %v2942_v18 = vmul.f32 1.442695, %v2889_v38 }
 0x523   :  { %4162 = vpow2.f32 %v2942_v18 }
 0x527   :  { %v5528_v16 = vpop.eup %4156 }
 0x528   :  { %3008 = vadd.xlane.f32.xlu0 %v5528_v16  ;;  %v2857_v53 = vpop.xlane.xlu0 %2856 }
 0x529   :  { %v5531_v54 = vpop.eup %4158  ;;  %v2894_v6 = vsub.f32 %v5413_v4, %v2857_v53 }
 0x52a   :  { %v2859_v33 = vpop.xlane.xlu1 %2858  ;;  %3010 = vadd.xlane.f32.xlu1 %v5531_v54 }
 0x52b   :  { %v5535_v56 = vpop.eup %4160  ;;  %v2952_v43 = vmul.f32 1.442695, %v2894_v6  ;;  %v2895_v47 = vsub.f32 %v5416_v7, %v2859_v33 }
 0x52c   :  { %3004 = vadd.xlane.f32.xlu0 %v5535_v56  ;;  %v2853_v49 = vpop.xlane.xlu0 %2852 }
 0x52d   :  { %v5539_v31 = vpop.eup %4162  ;;  %4164 = vpow2.f32 %v2952_v43  ;;  %v2954_v10 = vmul.f32 1.442695, %v2895_v47  ;;  %v2892_v17 = vsub.f32 %v5420_v60, %v2853_v49 }
 0x52e   :  { %v2855_v12 = vpop.xlane.xlu1 %2854  ;;  %3006 = vadd.xlane.f32.xlu1 %v5539_v31 }
 0x52f   :  { %4166 = vpow2.f32 %v2954_v10  ;;  %v2948_v4 = vmul.f32 1.442695, %v2892_v17  ;;  %v2893_v20 = vsub.f32 %v5424_v29, %v2855_v12 }
 0x531   :  { %4168 = vpow2.f32 %v2948_v4  ;;  %v2950_v55 = vmul.f32 1.442695, %v2893_v20 }
 0x533   :  { %4170 = vpow2.f32 %v2950_v55 }
 0x537   :  { %v5544_v7 = vpop.eup %4164 }
 0x538   :  { %3016 = vadd.xlane.f32.xlu0 %v5544_v7 }
 0x539   :  { %v5547_v46 = vpop.eup %4166  ;;  %v2861_v41 = vpop.xlane.xlu0 %2860 }
 0x53a   :  { %v2896_v62 = vsub.f32 %v5429_v21, %v2861_v41  ;;  %3018 = vadd.xlane.f32.xlu1 %v5547_v46 }
 0x53b   :  { %v5551_v60 = vpop.eup %4168  ;;  %v2863_v9 = vpop.xlane.xlu1 %2862 }
 0x53c   :  { %v2956_v32 = vmul.f32 1.442695, %v2896_v62  ;;  %v2897_v29 = vsub.f32 %v5432_v51, %v2863_v9  ;;  %3012 = vadd.xlane.f32.xlu0 %v5551_v60 }
 0x53d   :  { %v5555_v1 = vpop.eup %4170  ;;  %v2865_v14 = vpop.xlane.xlu0 %2864 }
 0x53e   :  { %4172 = vpow2.f32 %v2956_v32  ;;  %v2958_v35 = vmul.f32 1.442695, %v2897_v29  ;;  %v2898_v28 = vsub.f32 %v5436_v11, %v2865_v14  ;;  %3014 = vadd.xlane.f32.xlu1 %v5555_v1 }
 0x53f   :  { %v2867_v21 = vpop.xlane.xlu1 %2866 }
 0x540   :  { %4174 = vpow2.f32 %v2958_v35  ;;  %v2960_v48 = vmul.f32 1.442695, %v2898_v28  ;;  %v2899_v58 = vsub.f32 %v5440_v25, %v2867_v21 }
 0x542   :  { %4176 = vpow2.f32 %v2960_v48  ;;  %v2962_v37 = vmul.f32 1.442695, %v2899_v58 }
 0x544   :  { %4178 = vpow2.f32 %v2962_v37 }
 0x548   :  { %v5560_v51 = vpop.eup %4172 }
 0x549   :  { %3020 = vadd.xlane.f32.xlu0 %v5560_v51 }
 0x54a   :  { %v5563_v24 = vpop.eup %4174 }
 0x54b   :  { %3022 = vadd.xlane.f32.xlu1 %v5563_v24 }
 0x54c   :  { %v5566_v19 = vpop.eup %4176 }
 0x54d   :  { %3024 = vadd.xlane.f32.xlu0 %v5566_v19 }
 0x54e   :  { %v5569_v11 = vpop.eup %4178 }
 0x54f   :  { %3026 = vadd.xlane.f32.xlu1 %v5569_v11 }
 0x565   :  { %v2969_v25 = vpop.xlane.xlu0 %2968 }
 0x566   :  { %4180 = vrcp.f32 %v2969_v25 }
 0x569   :  { %v2971_v27 = vpop.xlane.xlu1 %2970  ;;  %v2965_v57 = vpop.xlane.xlu0 %2964 }
 0x56a   :  { %4182 = vrcp.f32 %v2971_v27 }
 0x56b   :  { %4184 = vrcp.f32 %v2965_v57 }
 0x56d   :  { %v2967_v5 = vpop.xlane.xlu1 %2966 }
 0x56e   :  { %4186 = vrcp.f32 %v2967_v5 }
 0x570   :  { %v4181_v50 = vpop.eup %4180 }
 0x571   :  { %v3062_v59 = vmul.f32 %v4181_v50, %v5448_v26 }
 0x573   :  { %3094 = vst [vmem:[%s5709_s9 + $0x10] sm:$0xff] %v3062_v59 }
 0x574   :  { %v4183_v38 = vpop.eup %4182 }
 0x575   :  { %v4185_v18 = vpop.eup %4184  ;;  %v3063_v53 = vmul.f32 %v4183_v38, %v5454_v36  ;;  %v2977_v6 = vpop.xlane.xlu0 %2976 }
 0x576   :  { %v3060_v33 = vmul.f32 %v4185_v18, %v5452_v13  ;;  %4188 = vrcp.f32 %v2977_v6 }
 0x577   :  { %3095 = vst [vmem:[%s5709_s9 + $0x18] sm:$0xff] %v3063_v53  ;;  %v2979_v43 = vpop.xlane.xlu1 %2978 }
 0x578   :  { %v4187_v47 = vpop.eup %4186  ;;  %3092 = vst [vmem:[%s5709_s9] sm:$0xff] %v3060_v33  ;;  %4190 = vrcp.f32 %v2979_v43 }
 0x579   :  { %v3061_v26 = vmul.f32 %v4187_v47, %v5460_v0  ;;  %v2973_v49 = vpop.xlane.xlu0 %2972 }
 0x57a   :  { %4192 = vrcp.f32 %v2973_v49 }
 0x57b   :  { %3093 = vst [vmem:[%s5709_s9 + $0x8] sm:$0xff] %v3061_v26  ;;  %v2975_v13 = vpop.xlane.xlu1 %2974 }
 0x57c   :  { %4194 = vrcp.f32 %v2975_v13 }
 0x580   :  { %v4189_v36 = vpop.eup %4188 }
 0x581   :  { %v3066_v10 = vmul.f32 %v4189_v36, %v5464_v3 }
 0x582   :  { %v4191_v17 = vpop.eup %4190 }
 0x583   :  { %3098 = vst [vmem:[%s5709_s9 + $0x30] sm:$0xff] %v3066_v10  ;;  %v3067_v12 = vmul.f32 %v4191_v17, %v5467_v45 }
 0x584   :  { %v4193_v4 = vpop.eup %4192 }
 0x585   :  { %3099 = vst [vmem:[%s5709_s9 + $0x38] sm:$0xff] %v3067_v12  ;;  %v3064_v0 = vmul.f32 %v4193_v4, %v5471_v42  ;;  %v2985_v20 = vpop.xlane.xlu0 %2984 }
 0x586   :  { %v4195_v55 = vpop.eup %4194  ;;  %4196 = vrcp.f32 %v2985_v20 }
 0x587   :  { %3096 = vst [vmem:[%s5709_s9 + $0x20] sm:$0xff] %v3064_v0  ;;  %v3065_v3 = vmul.f32 %v4195_v55, %v5475_v40  ;;  %v2987_v41 = vpop.xlane.xlu1 %2986 }
 0x588   :  { %4198 = vrcp.f32 %v2987_v41 }
 0x589   :  { %3097 = vst [vmem:[%s5709_s9 + $0x28] sm:$0xff] %v3065_v3  ;;  %v2981_v45 = vpop.xlane.xlu0 %2980 }
 0x58a   :  { %4200 = vrcp.f32 %v2981_v45 }
 0x58b   :  { %v2983_v62 = vpop.xlane.xlu1 %2982 }
 0x58c   :  { %4202 = vrcp.f32 %v2983_v62 }
 0x590   :  { %v4197_v42 = vpop.eup %4196 }
 0x591   :  { %v3070_v9 = vmul.f32 %v4197_v42, %v5480_v30 }
 0x592   :  { %v4199_v32 = vpop.eup %4198 }
 0x593   :  { %3102 = vst [vmem:[%s5709_s9 + $0x50] sm:$0xff] %v3070_v9  ;;  %v3071_v40 = vmul.f32 %v4199_v32, %v5483_v44 }
 0x594   :  { %v4201_v29 = vpop.eup %4200 }
 0x595   :  { %3103 = vst [vmem:[%s5709_s9 + $0x58] sm:$0xff] %v3071_v40  ;;  %v3068_v14 = vmul.f32 %v4201_v29, %v5487_v52  ;;  %v2993_v35 = vpop.xlane.xlu0 %2992 }
 0x596   :  { %v4203_v28 = vpop.eup %4202  ;;  %4204 = vrcp.f32 %v2993_v35 }
 0x597   :  { %3100 = vst [vmem:[%s5709_s9 + $0x40] sm:$0xff] %v3068_v14  ;;  %v3069_v30 = vmul.f32 %v4203_v28, %v5491_v34  ;;  %v2995_v21 = vpop.xlane.xlu1 %2994 }
 0x598   :  { %4206 = vrcp.f32 %v2995_v21 }
 0x599   :  { %3101 = vst [vmem:[%s5709_s9 + $0x48] sm:$0xff] %v3069_v30  ;;  %v2989_v44 = vpop.xlane.xlu0 %2988 }
 0x59a   :  { %4208 = vrcp.f32 %v2989_v44 }
 0x59b   :  { %v2991_v48 = vpop.xlane.xlu1 %2990 }
 0x59c   :  { %4210 = vrcp.f32 %v2991_v48 }
 0x5a0   :  { %v4205_v52 = vpop.eup %4204 }
 0x5a1   :  { %v3074_v58 = vmul.f32 %v4205_v52, %v5496_v61 }
 0x5a2   :  { %v4207_v37 = vpop.eup %4206 }
 0x5a3   :  { %3106 = vst [vmem:[%s5709_s9 + $0x70] sm:$0xff] %v3074_v58  ;;  %v3075_v34 = vmul.f32 %v4207_v37, %v5499_v63 }
 0x5a4   :  { %v4209_v25 = vpop.eup %4208 }
 0x5a5   :  { %3107 = vst [vmem:[%s5709_s9 + $0x78] sm:$0xff] %v3075_v34  ;;  %v3072_v27 = vmul.f32 %v4209_v25, %v5503_v2  ;;  %v3001_v57 = vpop.xlane.xlu0 %3000 }
 0x5a6   :  { %v4211_v5 = vpop.eup %4210  ;;  %4212 = vrcp.f32 %v3001_v57 }
 0x5a7   :  { %3104 = vst [vmem:[%s5709_s9 + $0x60] sm:$0xff] %v3072_v27  ;;  %v3073_v61 = vmul.f32 %v4211_v5, %v5507_v15  ;;  %v3003_v50 = vpop.xlane.xlu1 %3002 }
 0x5a8   :  { %4214 = vrcp.f32 %v3003_v50 }
 0x5a9   :  { %3105 = vst [vmem:[%s5709_s9 + $0x68] sm:$0xff] %v3073_v61  ;;  %v2997_v63 = vpop.xlane.xlu0 %2996 }
 0x5aa   :  { %4216 = vrcp.f32 %v2997_v63 }
 0x5ab   :  { %v2999_v59 = vpop.xlane.xlu1 %2998 }
 0x5ac   :  { %4218 = vrcp.f32 %v2999_v59 }
 0x5b0   :  { %v4213_v2 = vpop.eup %4212 }
 0x5b1   :  { %v3078_v38 = vmul.f32 %v4213_v2, %v5512_v22 }
 0x5b2   :  { %v4215_v18 = vpop.eup %4214 }
 0x5b3   :  { %3110 = vst [vmem:[%s5709_s9 + $0x90] sm:$0xff] %v3078_v38  ;;  %v3079_v15 = vmul.f32 %v4215_v18, %v5515_v23 }
 0x5b4   :  { %v4217_v53 = vpop.eup %4216 }
 0x5b5   :  { %3111 = vst [vmem:[%s5709_s9 + $0x98] sm:$0xff] %v3079_v15  ;;  %v3076_v6 = vmul.f32 %v4217_v53, %v5519_v8  ;;  %v3009_v33 = vpop.xlane.xlu0 %3008 }
 0x5b6   :  { %v4219_v43 = vpop.eup %4218  ;;  %4220 = vrcp.f32 %v3009_v33 }
 0x5b7   :  { %3108 = vst [vmem:[%s5709_s9 + $0x80] sm:$0xff] %v3076_v6  ;;  %v3077_v22 = vmul.f32 %v4219_v43, %v5523_v39  ;;  %v3011_v47 = vpop.xlane.xlu1 %3010 }
 0x5b8   :  { %4222 = vrcp.f32 %v3011_v47 }
 0x5b9   :  { %3109 = vst [vmem:[%s5709_s9 + $0x88] sm:$0xff] %v3077_v22  ;;  %v3005_v23 = vpop.xlane.xlu0 %3004 }
 0x5ba   :  { %4224 = vrcp.f32 %v3005_v23 }
 0x5bb   :  { %v3007_v26 = vpop.xlane.xlu1 %3006 }
 0x5bc   :  { %4226 = vrcp.f32 %v3007_v26 }
 0x5c0   :  { %v4221_v8 = vpop.eup %4220 }
 0x5c1   :  { %v3082_v49 = vmul.f32 %v4221_v8, %v5528_v16 }
 0x5c2   :  { %v4223_v13 = vpop.eup %4222 }
 0x5c3   :  { %3114 = vst [vmem:[%s5709_s9 + $0xb0] sm:$0xff] %v3082_v49  ;;  %v3083_v39 = vmul.f32 %v4223_v13, %v5531_v54 }
 0x5c4   :  { %v4225_v36 = vpop.eup %4224 }
 0x5c5   :  { %3115 = vst [vmem:[%s5709_s9 + $0xb8] sm:$0xff] %v3083_v39  ;;  %v3080_v10 = vmul.f32 %v4225_v36, %v5535_v56  ;;  %v3017_v17 = vpop.xlane.xlu0 %3016 }
 0x5c6   :  { %v4227_v12 = vpop.eup %4226  ;;  %4228 = vrcp.f32 %v3017_v17 }
 0x5c7   :  { %3112 = vst [vmem:[%s5709_s9 + $0xa0] sm:$0xff] %v3080_v10  ;;  %v3081_v16 = vmul.f32 %v4227_v12, %v5539_v31  ;;  %v3019_v4 = vpop.xlane.xlu1 %3018 }
 0x5c8   :  { %4230 = vrcp.f32 %v3019_v4 }
 0x5c9   :  { %3113 = vst [vmem:[%s5709_s9 + $0xa8] sm:$0xff] %v3081_v16  ;;  %v3013_v54 = vpop.xlane.xlu0 %3012 }
 0x5ca   :  { %4232 = vrcp.f32 %v3013_v54 }
 0x5cb   :  { %v3015_v0 = vpop.xlane.xlu1 %3014 }
 0x5cc   :  { %4234 = vrcp.f32 %v3015_v0 }
 0x5d0   :  { %v4229_v56 = vpop.eup %4228 }
 0x5d1   :  { %v3086_v20 = vmul.f32 %v4229_v56, %v5544_v7 }
 0x5d2   :  { %v4231_v55 = vpop.eup %4230 }
 0x5d3   :  { %3118 = vst [vmem:[%s5709_s9 + $0xd0] sm:$0xff] %v3086_v20  ;;  %v3087_v31 = vmul.f32 %v4231_v55, %v5547_v46 }
 0x5d4   :  { %v4233_v3 = vpop.eup %4232 }
 0x5d5   :  { %3119 = vst [vmem:[%s5709_s9 + $0xd8] sm:$0xff] %v3087_v31  ;;  %v3084_v41 = vmul.f32 %v4233_v3, %v5551_v60 }
 0x5d6   :  { %v4235_v45 = vpop.eup %4234  ;;  %v3021_v62 = vpop.xlane.xlu0 %3020 }
 0x5d7   :  { %3116 = vst [vmem:[%s5709_s9 + $0xc0] sm:$0xff] %v3084_v41  ;;  %v3085_v7 = vmul.f32 %v4235_v45, %v5555_v1  ;;  %4236 = vrcp.f32 %v3021_v62 }
 0x5d8   :  { %v3023_v42 = vpop.xlane.xlu1 %3022 }
 0x5d9   :  { %3117 = vst [vmem:[%s5709_s9 + $0xc8] sm:$0xff] %v3085_v7  ;;  %4238 = vrcp.f32 %v3023_v42 }
 0x5da   :  { %v3025_v46 = vpop.xlane.xlu0 %3024 }
 0x5db   :  { %4240 = vrcp.f32 %v3025_v46 }
 0x5dc   :  { %v3027_v9 = vpop.xlane.xlu1 %3026 }
 0x5dd   :  { %4242 = vrcp.f32 %v3027_v9 }
 0x5e1   :  { %v4237_v60 = vpop.eup %4236 }
 0x5e2   :  { %v3088_v32 = vmul.f32 %v4237_v60, %v5560_v51 }
 0x5e3   :  { %v4239_v40 = vpop.eup %4238 }
 0x5e4   :  { %3120 = vst [vmem:[%s5709_s9 + $0xe0] sm:$0xff] %v3088_v32  ;;  %v3089_v1 = vmul.f32 %v4239_v40, %v5563_v24 }
 0x5e5   :  { %v4241_v29 = vpop.eup %4240 }
 0x5e6   :  { %3121 = vst [vmem:[%s5709_s9 + $0xe8] sm:$0xff] %v3089_v1  ;;  %v3090_v14 = vmul.f32 %v4241_v29, %v5566_v19 }
 0x5e7   :  { %v4243_v35 = vpop.eup %4242 }
 0x5e8   :  { %3122 = vst [vmem:[%s5709_s9 + $0xf0] sm:$0xff] %v3090_v14  ;;  %v3091_v51 = vmul.f32 %v4243_v35, %v5569_v11 }
 0x5ea   :  { %3123 = vst [vmem:[%s5709_s9 + $0xf8] sm:$0xff] %v3091_v51 }

</bundles_post_ra>
